<compile_context>
chip_gen: v7x
topology: tpu7x:2x2x1
jax: 0.10.0
libtpu: 0.0.40
codegen_flags: <defaults>
</compile_context>

<pallas_src>
import functools
import math

import jax
import jax.numpy as jnp
from jax.experimental import pallas as pl
from jax.experimental.pallas import tpu as pltpu


PARAM_ORDER = ["wq", "bq", "wk", "bk", "wv", "bv", "wo", "bo",
               "g1", "be1", "w1", "bf1", "w2", "bf2", "g2", "be2"]


# ---------------------------------------------------------------------------
# Kernel: the full encoder stack.  grid = (batch_blocks, n_layers).
# res_ref holds the VMEM-resident f32 residual stream for the current batch
# block; o_ref (HBM output) is written only at the last layer.
# ---------------------------------------------------------------------------
def encoder_stack_kernel(
    x_ref,
    wq_ref, bq_ref, wk_ref, bk_ref, wv_ref, bv_ref,
    wo_ref, bo_ref,
    g1_ref, be1_ref,
    w1_ref, bf1_ref, w2_ref, bf2_ref,
    g2_ref, be2_ref,
    o_ref,
    res_ref, ctx_ref,
    *, n_head,
):
    layer = pl.program_id(1)
    last_layer = pl.num_programs(1) - 1

    bb, L, D = o_ref.shape
    dh = D // n_head
    rows = bb * L

    # Layer 0 of each batch block: load the input into the resident buffer.
    @pl.when(layer == 0)
    def _init():
        res_ref[...] = x_ref[...].astype(jnp.float32).reshape(rows, D)

    x = res_ref[...]                         # (rows, D) f32 residual stream
    xb = x.astype(jnp.bfloat16)

    def linear_bf16(a_bf16, w_ref, b_ref):
        # bf16 matmul on the MXU, f32 accumulation + bias, cast fused into
        # the epilogue (no separate f32 round-trip).
        y = jnp.dot(a_bf16, w_ref[0], preferred_element_type=jnp.float32)
        return (y + b_ref[0]).astype(jnp.bfloat16)

    def linear_f32(a_bf16, w_ref, b_ref):
        return jnp.dot(a_bf16, w_ref[0],
                       preferred_element_type=jnp.float32) + b_ref[0]

    def layernorm(a, g_ref, b_ref, eps=1e-12):
        # Single-pass statistics: var = E[x^2] - E[x]^2 (unbiased=False).
        mean = jnp.mean(a, axis=-1, keepdims=True)
        msq = jnp.mean(a * a, axis=-1, keepdims=True)
        var = jnp.maximum(msq - mean * mean, 0.0)
        return g_ref[0] * ((a - mean) * jax.lax.rsqrt(var + eps)) + b_ref[0]

    # ---------------- multi-head self-attention ----------------------------
    # 1/sqrt(dh) is already folded into wq / bq on the host.
    q3 = linear_bf16(xb, wq_ref, bq_ref).reshape(bb, L, D)
    k3 = linear_bf16(xb, wk_ref, bk_ref).reshape(bb, L, D)
    v3 = linear_bf16(xb, wv_ref, bv_ref).reshape(bb, L, D)

    # Per-head score/softmax/PV; each head's context goes straight into the
    # bf16 ctx scratch so the output projection below is a single full-depth
    # (rows, D) x (D, D) matmul (one MXU drain, no per-head f32 adds).
    # TODO(synk): for large n_head / long L, switch to a batched-head layout
    # (flash-style KV tiling + (bb*H, L, dh) views) once the required 4-D
    # relayout is profiled; the static unroll here keeps lowering simple and
    # each head's intermediates die at the scratch store.
    for h in range(n_head):
        lo = h * dh
        qh = q3[:, :, lo:lo + dh]            # (bb, L, dh) bf16
        kh = k3[:, :, lo:lo + dh]
        vh = v3[:, :, lo:lo + dh]
        # Batched over bb, contracting dh — no explicit K^T transpose.
        s = jnp.einsum("bqd,bkd->bqk", qh, kh,
                       preferred_element_type=jnp.float32)       # (bb, L, L)
        s = s - jnp.max(s, axis=-1, keepdims=True)
        p = jnp.exp(s)
        p = p * pl.reciprocal(jnp.sum(p, axis=-1, keepdims=True), approx=True)
        ctx = jnp.einsum("bqk,bkd->bqd", p.astype(jnp.bfloat16), vh,
                         preferred_element_type=jnp.float32)     # (bb, L, dh)
        ctx_ref[:, lo:lo + dh] = ctx.reshape(rows, dh).astype(jnp.bfloat16)

    # Single output projection over all heads (K = D, not K = dh).
    attn = jnp.dot(ctx_ref[...], wo_ref[0],
                   preferred_element_type=jnp.float32) + bo_ref[0]

    # dropout1 == identity (inference)
    h1 = layernorm(x + attn, g1_ref, be1_ref)        # (rows, D) f32

    # ---------------- position-wise feed-forward ----------------------------
    # TODO(synk): for large D / ffn_hidden (e.g. >=1024/4096) on v7x (64 MiB
    # VMEM), stream w1/w2 in hidden-dim chunks (memory_space=pl.ANY +
    # pltpu.emit_pipeline) instead of whole-layer weight blocks.
    f = linear_bf16(h1.astype(jnp.bfloat16), w1_ref, bf1_ref)    # (rows, F)
    f = jnp.maximum(f, 0.0)
    # dropout inside FFN == identity (inference)
    f = linear_f32(f, w2_ref, bf2_ref)                           # (rows, D)

    # dropout2 == identity (inference)
    out = layernorm(h1 + f, g2_ref, be2_ref)
    res_ref[...] = out

    # Only the final layer writes the HBM output block (one writeback per
    # batch block).  Output kept f32 to match the PyTorch module's dtype.
    @pl.when(layer == last_layer)
    def _store():
        o_ref[...] = out.reshape(bb, L, D)


# ---------------------------------------------------------------------------
# Host-side parameter preparation: stack per-layer params along a leading
# layer axis, fold 1/sqrt(dh) into W_q/b_q, and cast matmul weights to bf16
# (biases / LayerNorm params stay f32).
# ---------------------------------------------------------------------------
def prepare_stacked_params(layer_params, n_head):
    D = layer_params[0]["wq"].shape[0]
    dh = D // n_head
    scale = 1.0 / math.sqrt(dh)

    def stack(name):
        return jnp.stack([p[name] for p in layer_params], axis=0)

    packed = {
        "wq": (stack("wq") * scale).astype(jnp.bfloat16),
        "bq": stack("bq") * scale,
        "wk": stack("wk").astype(jnp.bfloat16),
        "bk": stack("bk"),
        "wv": stack("wv").astype(jnp.bfloat16),
        "bv": stack("bv"),
        "wo": stack("wo").astype(jnp.bfloat16),
        "bo": stack("bo"),
        "g1": stack("g1"),
        "be1": stack("be1"),
        "w1": stack("w1").astype(jnp.bfloat16),
        "bf1": stack("bf1"),
        "w2": stack("w2").astype(jnp.bfloat16),
        "bf2": stack("bf2"),
        "g2": stack("g2"),
        "be2": stack("be2"),
    }
    return [packed[name] for name in PARAM_ORDER]


# ---------------------------------------------------------------------------
# Generation-aware VMEM limit and batch-block selection.
# ---------------------------------------------------------------------------
def _vmem_limit_bytes():
    try:
        cap = int(pltpu.get_tpu_info().vmem_capacity_bytes)
    except Exception:
        cap = 64 * 1024 * 1024          # conservative (v7x-sized) fallback
    # Leave headroom below physical for compiler temporaries:
    #   v7x (64 MiB)  -> 56 MiB,   v5e/v6e (128 MiB) -> 110 MiB.
    return min(cap * 7 // 8, 110 * 1024 * 1024)


def _estimate_vmem_bytes(block_b, L, D, F, n_head):
    rows = block_b * L
    # Double-buffered bf16 layer weights (the dominant term for real D/F).
    w_bytes = 2 * 2 * (4 * D * D + 2 * D * F)
    # Residual (f32) + ctx (bf16) scratches.
    act = rows * (4 * D + 2 * D)
    # x-in / out blocks (f32), double-buffered.
    act += 2 * 2 * rows * 4 * D
    # Working set: q/k/v bf16, attn/h1/out f32, ffn-hidden bf16, one head's
    # scores f32.
    act += rows * (3 * 2 * D + 3 * 4 * D + 2 * F) + 2 * block_b * L * L * 4
    return w_bytes + act


def _pick_block_b(B, L, D, F, n_head, target_rows, vmem_limit):
    divisors = [d for d in range(1, B + 1) if B % d == 0]
    budget = int(vmem_limit * 0.6)
    best = 1
    for d in divisors:
        if _estimate_vmem_bytes(d, L, D, F, n_head) <= budget:
            best = d
        if d * L >= 4 * target_rows:     # diminishing returns past ~4x target
            break
    # Give multi-TC chips at least 2 parallel batch blocks when it does not
    # drop the per-step row count below the MXU-feeding target.
    if B // best == 1:
        for d in reversed(divisors):
            if d < best and d * L >= target_rows:
                best = d
                break
    return best


# ---------------------------------------------------------------------------
# Wrapper: single pallas_call for the whole encoder stack.
# ---------------------------------------------------------------------------
def encoder_forward(x, layer_params, n_head, *, block_b=None, target_rows=256):
    B, L, D = x.shape
    n_layers = len(layer_params)
    F = layer_params[0]["w1"].shape[1]
    assert D % n_head == 0, "d_model must be divisible by n_head"
    # Note: for production shapes, pad d_model / ffn_hidden to multiples of
    # 128 (and block_b*L to a multiple of 8); sub-128 lane widths run on
    # masked vregs.  Demo shapes below are intentionally tiny.

    vmem_limit = _vmem_limit_bytes()
    if block_b is None:
        block_b = _pick_block_b(B, L, D, F, n_head, target_rows, vmem_limit)
    assert B % block_b == 0

    weights = prepare_stacked_params(layer_params, n_head)

    def param_spec(arr):
        zeros = (0,) * (arr.ndim - 1)
        return pl.BlockSpec((1,) + tuple(arr.shape[1:]),
                            lambda b, l, _z=zeros: (l,) + _z)

    act_spec = pl.BlockSpec((block_b, L, D), lambda b, l: (b, 0, 0))
    in_specs = [act_spec] + [param_spec(w) for w in weights]

    kernel = functools.partial(encoder_stack_kernel, n_head=n_head)
    rows = block_b * L

    return pl.pallas_call(
        kernel,
        out_shape=jax.ShapeDtypeStruct((B, L, D), jnp.float32),
        grid_spec=pltpu.PrefetchScalarGridSpec(
            num_scalar_prefetch=0,
            grid=(B // block_b, n_layers),       # layer axis innermost
            in_specs=in_specs,
            out_specs=pl.BlockSpec((block_b, L, D), lambda b, l: (b, 0, 0)),
            scratch_shapes=[
                pltpu.VMEM((rows, D), jnp.float32),    # resident residual
                pltpu.VMEM((rows, D), jnp.bfloat16),   # per-head ctx assembly
            ],
        ),
        compiler_params=pltpu.CompilerParams(
            dimension_semantics=("parallel", "arbitrary"),
            vmem_limit_bytes=vmem_limit,
        ),
    )(x.astype(jnp.float32), *weights)


# ---------------------------------------------------------------------------
# Deterministic parameter initialization (synthetic, no checkpoint).
# ---------------------------------------------------------------------------
def init_layer_params(key, d_model, ffn_hidden):
    ks = jax.random.split(key, 6)
    s = 0.02
    return {
        "wq": jax.random.normal(ks[0], (d_model, d_model), jnp.float32) * s,
        "wk": jax.random.normal(ks[1], (d_model, d_model), jnp.float32) * s,
        "wv": jax.random.normal(ks[2], (d_model, d_model), jnp.float32) * s,
        "wo": jax.random.normal(ks[3], (d_model, d_model), jnp.float32) * s,
        "w1": jax.random.normal(ks[4], (d_model, ffn_hidden), jnp.float32) * s,
        "w2": jax.random.normal(ks[5], (ffn_hidden, d_model), jnp.float32) * s,
        "bq": jnp.zeros((1, d_model), jnp.float32),
        "bk": jnp.zeros((1, d_model), jnp.float32),
        "bv": jnp.zeros((1, d_model), jnp.float32),
        "bo": jnp.zeros((1, d_model), jnp.float32),
        "bf1": jnp.zeros((1, ffn_hidden), jnp.float32),
        "bf2": jnp.zeros((1, d_model), jnp.float32),
        "g1": jnp.ones((1, d_model), jnp.float32),
        "be1": jnp.zeros((1, d_model), jnp.float32),
        "g2": jnp.ones((1, d_model), jnp.float32),
        "be2": jnp.zeros((1, d_model), jnp.float32),
    }


# ---------------------------------------------------------------------------
# Pure-JAX f32 reference (PyTorch-faithful) for a correctness sanity check.
# ---------------------------------------------------------------------------
def reference_layer(x, p, n_head):
    B, L, D = x.shape
    dh = D // n_head

    def lin(a, w, b):
        return a @ w + b

    def ln(a, g, b, eps=1e-12):
        m = a.mean(-1, keepdims=True)
        v = ((a - m) ** 2).mean(-1, keepdims=True)
        return g * ((a - m) / jnp.sqrt(v + eps)) + b

    q = lin(x, p["wq"], p["bq"]).reshape(B, L, n_head, dh).transpose(0, 2, 1, 3)
    k = lin(x, p["wk"], p["bk"]).reshape(B, L, n_head, dh).transpose(0, 2, 1, 3)
    v = lin(x, p["wv"], p["bv"]).reshape(B, L, n_head, dh).transpose(0, 2, 1, 3)
    s = jnp.einsum("bhld,bhmd->bhlm", q, k) / math.sqrt(dh)
    pmat = jax.nn.softmax(s, axis=-1)
    o = jnp.einsum("bhlm,bhmd->bhld", pmat, v)
    o = o.transpose(0, 2, 1, 3).reshape(B, L, D)
    o = lin(o, p["wo"], p["bo"])
    h1 = ln(x + o, p["g1"], p["be1"])
    ff = lin(jnp.maximum(lin(h1, p["w1"], p["bf1"]), 0.0), p["w2"], p["bf2"])
    return ln(h1 + ff, p["g2"], p["be2"])


def reference_encoder(x, layer_params, n_head):
    for p in layer_params:
        x = reference_layer(x, p, n_head)
    return x


# ---------------------------------------------------------------------------
if __name__ == "__main__":
    B, L, D = 2, 8, 32
    n_head = 4
    ffn_hidden = 64
    n_layers = 2

    key = jax.random.PRNGKey(0)
    x = jax.random.normal(key, (B, L, D), jnp.float32)

    pkey = jax.random.PRNGKey(42)
    layer_params = [init_layer_params(jax.random.fold_in(pkey, i), D, ffn_hidden)
                    for i in range(n_layers)]

    out = encoder_forward(x, layer_params, n_head)
    out = jax.block_until_ready(out)

    ref = reference_encoder(x, layer_params, n_head)
    assert out.shape == (B, L, D)
    # bf16 matmuls (f32 accumulation) + approx softmax reciprocal -> relaxed
    # tolerance vs. the pure-f32 reference.
    assert jnp.allclose(out, ref, atol=3e-2, rtol=3e-2), "mismatch vs reference"

    print("KERNEL_OK")
</pallas_src>

<mosaic_0001>
module attributes {stable_mosaic.version = 11 : i64} {
  func.func @encoder_stack_kernel(%arg0: i32, %arg1: i32, %arg2: memref<2x8x32xf32, #tpu.memory_space<vmem>>, %arg3: memref<1x32x32xbf16, #tpu.memory_space<vmem>>, %arg4: memref<1x1x32xf32, #tpu.memory_space<vmem>>, %arg5: memref<1x32x32xbf16, #tpu.memory_space<vmem>>, %arg6: memref<1x1x32xf32, #tpu.memory_space<vmem>>, %arg7: memref<1x32x32xbf16, #tpu.memory_space<vmem>>, %arg8: memref<1x1x32xf32, #tpu.memory_space<vmem>>, %arg9: memref<1x32x32xbf16, #tpu.memory_space<vmem>>, %arg10: memref<1x1x32xf32, #tpu.memory_space<vmem>>, %arg11: memref<1x1x32xf32, #tpu.memory_space<vmem>>, %arg12: memref<1x1x32xf32, #tpu.memory_space<vmem>>, %arg13: memref<1x32x64xbf16, #tpu.memory_space<vmem>>, %arg14: memref<1x1x64xf32, #tpu.memory_space<vmem>>, %arg15: memref<1x64x32xbf16, #tpu.memory_space<vmem>>, %arg16: memref<1x1x32xf32, #tpu.memory_space<vmem>>, %arg17: memref<1x1x32xf32, #tpu.memory_space<vmem>>, %arg18: memref<1x1x32xf32, #tpu.memory_space<vmem>>, %arg19: memref<2x8x32xf32, #tpu.memory_space<vmem>>, %arg20: memref<16x32xf32, #tpu.memory_space<vmem>>, %arg21: memref<16x32xbf16, #tpu.memory_space<vmem>>) attributes {dimension_semantics = [#tpu.dimension_semantics<parallel>, #tpu.dimension_semantics<arbitrary>], iteration_bounds = array<i64: 1, 2>, scalar_prefetch = 0 : i64, scratch_operands = 2 : i64, tpu.core_type = #tpu.core_type<tc>, window_params = [{transform_indices = @transform_0, window_bounds = array<i64: 2, 8, 32>}, {transform_indices = @transform_1, window_bounds = array<i64: 1, 32, 32>}, {transform_indices = @transform_2, window_bounds = array<i64: 1, 1, 32>}, {transform_indices = @transform_3, window_bounds = array<i64: 1, 32, 32>}, {transform_indices = @transform_4, window_bounds = array<i64: 1, 1, 32>}, {transform_indices = @transform_5, window_bounds = array<i64: 1, 32, 32>}, {transform_indices = @transform_6, window_bounds = array<i64: 1, 1, 32>}, {transform_indices = @transform_7, window_bounds = array<i64: 1, 32, 32>}, {transform_indices = @transform_8, window_bounds = array<i64: 1, 1, 32>}, {transform_indices = @transform_9, window_bounds = array<i64: 1, 1, 32>}, {transform_indices = @transform_10, window_bounds = array<i64: 1, 1, 32>}, {transform_indices = @transform_11, window_bounds = array<i64: 1, 32, 64>}, {transform_indices = @transform_12, window_bounds = array<i64: 1, 1, 64>}, {transform_indices = @transform_13, window_bounds = array<i64: 1, 64, 32>}, {transform_indices = @transform_14, window_bounds = array<i64: 1, 1, 32>}, {transform_indices = @transform_15, window_bounds = array<i64: 1, 1, 32>}, {transform_indices = @transform_16, window_bounds = array<i64: 1, 1, 32>}, {transform_indices = @transform_17, window_bounds = array<i64: 2, 8, 32>}]} {
    %c0_i32 = arith.constant 0 : i32
    %0 = arith.cmpi eq, %arg1, %c0_i32 : i32
    %1 = arith.extui %0 : i1 to i32
    %c0_i32_0 = arith.constant 0 : i32
    %2 = arith.cmpi ne, %1, %c0_i32_0 : i32
    scf.if %2 {
      %c0_94 = arith.constant 0 : index
      %c0_95 = arith.constant 0 : index
      %c0_96 = arith.constant 0 : index
      %196 = vector.load %arg2[%c0_94, %c0_95, %c0_96] : memref<2x8x32xf32, #tpu.memory_space<vmem>>, vector<2x8x32xf32>
      %197 = vector.shape_cast %196 : vector<2x8x32xf32> to vector<16x32xf32>
      %c0_97 = arith.constant 0 : index
      %c0_98 = arith.constant 0 : index
      %198 = vector.load %arg20[%c0_97, %c0_98] : memref<16x32xf32, #tpu.memory_space<vmem>>, vector<16x32xf32>
      tpu.vector_store %arg20[%c0_97, %c0_98], %197 {strides = array<i32>} : memref<16x32xf32, #tpu.memory_space<vmem>>, vector<16x32xf32>,
    } else {
    }
    %c0 = arith.constant 0 : index
    %c0_1 = arith.constant 0 : index
    %3 = vector.load %arg20[%c0, %c0_1] : memref<16x32xf32, #tpu.memory_space<vmem>>, vector<16x32xf32>
    %4 = arith.truncf %3 : vector<16x32xf32> to vector<16x32xbf16>
    %c0_2 = arith.constant 0 : index
    %c0_3 = arith.constant 0 : index
    %c0_4 = arith.constant 0 : index
    %5 = vector.load %arg3[%c0_2, %c0_3, %c0_4] : memref<1x32x32xbf16, #tpu.memory_space<vmem>>, vector<1x32x32xbf16>
    %6 = vector.shape_cast %5 : vector<1x32x32xbf16> to vector<32x32xbf16>
    %cst = arith.constant dense<0.000000e+00> : vector<16x32xf32>
    %7 = tpu.matmul %4, %6, %cst {dimension_numbers = #tpu.dot_dimension_numbers<[1], [0], [0], [1], [0, 0, 1, 1], [], []>} : vector<16x32xbf16>, vector<32x32xbf16>, vector<16x32xf32> -> vector<16x32xf32>
    %c0_5 = arith.constant 0 : index
    %c0_6 = arith.constant 0 : index
    %c0_7 = arith.constant 0 : index
    %8 = vector.load %arg4[%c0_5, %c0_6, %c0_7] : memref<1x1x32xf32, #tpu.memory_space<vmem>>, vector<1x1x32xf32>
    %9 = vector.shape_cast %8 : vector<1x1x32xf32> to vector<1x32xf32>
    %10 = vector.broadcast %9 : vector<1x32xf32> to vector<16x32xf32>
    %11 = arith.addf %7, %10 : vector<16x32xf32>
    %12 = arith.truncf %11 : vector<16x32xf32> to vector<16x32xbf16>
    %13 = vector.shape_cast %12 : vector<16x32xbf16> to vector<2x8x32xbf16>
    %c0_8 = arith.constant 0 : index
    %c0_9 = arith.constant 0 : index
    %c0_10 = arith.constant 0 : index
    %14 = vector.load %arg5[%c0_8, %c0_9, %c0_10] : memref<1x32x32xbf16, #tpu.memory_space<vmem>>, vector<1x32x32xbf16>
    %15 = vector.shape_cast %14 : vector<1x32x32xbf16> to vector<32x32xbf16>
    %cst_11 = arith.constant dense<0.000000e+00> : vector<16x32xf32>
    %16 = tpu.matmul %4, %15, %cst_11 {dimension_numbers = #tpu.dot_dimension_numbers<[1], [0], [0], [1], [0, 0, 1, 1], [], []>} : vector<16x32xbf16>, vector<32x32xbf16>, vector<16x32xf32> -> vector<16x32xf32>
    %c0_12 = arith.constant 0 : index
    %c0_13 = arith.constant 0 : index
    %c0_14 = arith.constant 0 : index
    %17 = vector.load %arg6[%c0_12, %c0_13, %c0_14] : memref<1x1x32xf32, #tpu.memory_space<vmem>>, vector<1x1x32xf32>
    %18 = vector.shape_cast %17 : vector<1x1x32xf32> to vector<1x32xf32>
    %19 = vector.broadcast %18 : vector<1x32xf32> to vector<16x32xf32>
    %20 = arith.addf %16, %19 : vector<16x32xf32>
    %21 = arith.truncf %20 : vector<16x32xf32> to vector<16x32xbf16>
    %22 = vector.shape_cast %21 : vector<16x32xbf16> to vector<2x8x32xbf16>
    %c0_15 = arith.constant 0 : index
    %c0_16 = arith.constant 0 : index
    %c0_17 = arith.constant 0 : index
    %23 = vector.load %arg7[%c0_15, %c0_16, %c0_17] : memref<1x32x32xbf16, #tpu.memory_space<vmem>>, vector<1x32x32xbf16>
    %24 = vector.shape_cast %23 : vector<1x32x32xbf16> to vector<32x32xbf16>
    %cst_18 = arith.constant dense<0.000000e+00> : vector<16x32xf32>
    %25 = tpu.matmul %4, %24, %cst_18 {dimension_numbers = #tpu.dot_dimension_numbers<[1], [0], [0], [1], [0, 0, 1, 1], [], []>} : vector<16x32xbf16>, vector<32x32xbf16>, vector<16x32xf32> -> vector<16x32xf32>
    %c0_19 = arith.constant 0 : index
    %c0_20 = arith.constant 0 : index
    %c0_21 = arith.constant 0 : index
    %26 = vector.load %arg8[%c0_19, %c0_20, %c0_21] : memref<1x1x32xf32, #tpu.memory_space<vmem>>, vector<1x1x32xf32>
    %27 = vector.shape_cast %26 : vector<1x1x32xf32> to vector<1x32xf32>
    %28 = vector.broadcast %27 : vector<1x32xf32> to vector<16x32xf32>
    %29 = arith.addf %25, %28 : vector<16x32xf32>
    %30 = arith.truncf %29 : vector<16x32xf32> to vector<16x32xbf16>
    %31 = vector.shape_cast %30 : vector<16x32xbf16> to vector<2x8x32xbf16>
    %32 = vector.extract_strided_slice %13 {offsets = [0, 0, 0], sizes = [2, 8, 8], strides = [1, 1, 1]} : vector<2x8x32xbf16> to vector<2x8x8xbf16>
    %33 = vector.extract_strided_slice %22 {offsets = [0, 0, 0], sizes = [2, 8, 8], strides = [1, 1, 1]} : vector<2x8x32xbf16> to vector<2x8x8xbf16>
    %34 = vector.extract_strided_slice %31 {offsets = [0, 0, 0], sizes = [2, 8, 8], strides = [1, 1, 1]} : vector<2x8x32xbf16> to vector<2x8x8xbf16>
    "tpu.trace_start"() <{level = 10 : i32, message = "bqd,bkd->bqk"}> : () -> ()
    %cst_22 = arith.constant dense<0.000000e+00> : vector<2x8x8xf32>
    %35 = tpu.matmul %32, %33, %cst_22 {dimension_numbers = #tpu.dot_dimension_numbers<[2], [2], [1], [1], [0, 0, 0, 1, 1, 1], [0], [0]>} : vector<2x8x8xbf16>, vector<2x8x8xbf16>, vector<2x8x8xf32> -> vector<2x8x8xf32>
    "tpu.trace_stop"() : () -> ()
    %cst_23 = arith.constant dense<0xFF800000> : vector<2x8xf32>
    %36 = vector.multi_reduction <maximumf>, %35, %cst_23 [2] : vector<2x8x8xf32> to vector<2x8xf32>
    %37 = vector.shape_cast %36 : vector<2x8xf32> to vector<2x8x1xf32>
    %38 = vector.broadcast %37 : vector<2x8x1xf32> to vector<2x8x8xf32>
    %39 = arith.subf %35, %38 : vector<2x8x8xf32>
    %40 = math.exp %39 : vector<2x8x8xf32>
    %cst_24 = arith.constant dense<0.000000e+00> : vector<2x8xf32>
    %41 = vector.multi_reduction <add>, %40, %cst_24 [2] : vector<2x8x8xf32> to vector<2x8xf32>
    %42 = vector.shape_cast %41 : vector<2x8xf32> to vector<2x8x1xf32>
    %43 = tpu.reciprocal %42 {approx = true} : vector<2x8x1xf32> -> vector<2x8x1xf32>
    %44 = vector.broadcast %43 : vector<2x8x1xf32> to vector<2x8x8xf32>
    %45 = arith.mulf %40, %44 : vector<2x8x8xf32>
    %46 = arith.truncf %45 : vector<2x8x8xf32> to vector<2x8x8xbf16>
    "tpu.trace_start"() <{level = 10 : i32, message = "bqk,bkd->bqd"}> : () -> ()
    %cst_25 = arith.constant dense<0.000000e+00> : vector<2x8x8xf32>
    %47 = tpu.matmul %46, %34, %cst_25 {dimension_numbers = #tpu.dot_dimension_numbers<[2], [1], [1], [2], [0, 0, 0, 1, 1, 2], [0], [0]>} : vector<2x8x8xbf16>, vector<2x8x8xbf16>, vector<2x8x8xf32> -> vector<2x8x8xf32>
    "tpu.trace_stop"() : () -> ()
    %48 = vector.shape_cast %47 : vector<2x8x8xf32> to vector<16x8xf32>
    %49 = arith.truncf %48 : vector<16x8xf32> to vector<16x8xbf16>
    %c0_26 = arith.constant 0 : index
    %c0_27 = arith.constant 0 : index
    %50 = vector.load %arg21[%c0_26, %c0_27] : memref<16x32xbf16, #tpu.memory_space<vmem>>, vector<16x8xbf16>
    tpu.vector_store %arg21[%c0_26, %c0_27], %49 {strides = array<i32>} : memref<16x32xbf16, #tpu.memory_space<vmem>>, vector<16x8xbf16>,
    %51 = vector.extract_strided_slice %13 {offsets = [0, 0, 8], sizes = [2, 8, 8], strides = [1, 1, 1]} : vector<2x8x32xbf16> to vector<2x8x8xbf16>
    %52 = vector.extract_strided_slice %22 {offsets = [0, 0, 8], sizes = [2, 8, 8], strides = [1, 1, 1]} : vector<2x8x32xbf16> to vector<2x8x8xbf16>
    %53 = vector.extract_strided_slice %31 {offsets = [0, 0, 8], sizes = [2, 8, 8], strides = [1, 1, 1]} : vector<2x8x32xbf16> to vector<2x8x8xbf16>
    "tpu.trace_start"() <{level = 10 : i32, message = "bqd,bkd->bqk"}> : () -> ()
    %cst_28 = arith.constant dense<0.000000e+00> : vector<2x8x8xf32>
    %54 = tpu.matmul %51, %52, %cst_28 {dimension_numbers = #tpu.dot_dimension_numbers<[2], [2], [1], [1], [0, 0, 0, 1, 1, 1], [0], [0]>} : vector<2x8x8xbf16>, vector<2x8x8xbf16>, vector<2x8x8xf32> -> vector<2x8x8xf32>
    "tpu.trace_stop"() : () -> ()
    %cst_29 = arith.constant dense<0xFF800000> : vector<2x8xf32>
    %55 = vector.multi_reduction <maximumf>, %54, %cst_29 [2] : vector<2x8x8xf32> to vector<2x8xf32>
    %56 = vector.shape_cast %55 : vector<2x8xf32> to vector<2x8x1xf32>
    %57 = vector.broadcast %56 : vector<2x8x1xf32> to vector<2x8x8xf32>
    %58 = arith.subf %54, %57 : vector<2x8x8xf32>
    %59 = math.exp %58 : vector<2x8x8xf32>
    %cst_30 = arith.constant dense<0.000000e+00> : vector<2x8xf32>
    %60 = vector.multi_reduction <add>, %59, %cst_30 [2] : vector<2x8x8xf32> to vector<2x8xf32>
    %61 = vector.shape_cast %60 : vector<2x8xf32> to vector<2x8x1xf32>
    %62 = tpu.reciprocal %61 {approx = true} : vector<2x8x1xf32> -> vector<2x8x1xf32>
    %63 = vector.broadcast %62 : vector<2x8x1xf32> to vector<2x8x8xf32>
    %64 = arith.mulf %59, %63 : vector<2x8x8xf32>
    %65 = arith.truncf %64 : vector<2x8x8xf32> to vector<2x8x8xbf16>
    "tpu.trace_start"() <{level = 10 : i32, message = "bqk,bkd->bqd"}> : () -> ()
    %cst_31 = arith.constant dense<0.000000e+00> : vector<2x8x8xf32>
    %66 = tpu.matmul %65, %53, %cst_31 {dimension_numbers = #tpu.dot_dimension_numbers<[2], [1], [1], [2], [0, 0, 0, 1, 1, 2], [0], [0]>} : vector<2x8x8xbf16>, vector<2x8x8xbf16>, vector<2x8x8xf32> -> vector<2x8x8xf32>
    "tpu.trace_stop"() : () -> ()
    %67 = vector.shape_cast %66 : vector<2x8x8xf32> to vector<16x8xf32>
    %68 = arith.truncf %67 : vector<16x8xf32> to vector<16x8xbf16>
    %c0_32 = arith.constant 0 : index
    %c8 = arith.constant 8 : index
    %69 = vector.load %arg21[%c0_32, %c8] : memref<16x32xbf16, #tpu.memory_space<vmem>>, vector<16x8xbf16>
    tpu.vector_store %arg21[%c0_32, %c8], %68 {strides = array<i32>} : memref<16x32xbf16, #tpu.memory_space<vmem>>, vector<16x8xbf16>,
    %70 = vector.extract_strided_slice %13 {offsets = [0, 0, 16], sizes = [2, 8, 8], strides = [1, 1, 1]} : vector<2x8x32xbf16> to vector<2x8x8xbf16>
    %71 = vector.extract_strided_slice %22 {offsets = [0, 0, 16], sizes = [2, 8, 8], strides = [1, 1, 1]} : vector<2x8x32xbf16> to vector<2x8x8xbf16>
    %72 = vector.extract_strided_slice %31 {offsets = [0, 0, 16], sizes = [2, 8, 8], strides = [1, 1, 1]} : vector<2x8x32xbf16> to vector<2x8x8xbf16>
    "tpu.trace_start"() <{level = 10 : i32, message = "bqd,bkd->bqk"}> : () -> ()
    %cst_33 = arith.constant dense<0.000000e+00> : vector<2x8x8xf32>
    %73 = tpu.matmul %70, %71, %cst_33 {dimension_numbers = #tpu.dot_dimension_numbers<[2], [2], [1], [1], [0, 0, 0, 1, 1, 1], [0], [0]>} : vector<2x8x8xbf16>, vector<2x8x8xbf16>, vector<2x8x8xf32> -> vector<2x8x8xf32>
    "tpu.trace_stop"() : () -> ()
    %cst_34 = arith.constant dense<0xFF800000> : vector<2x8xf32>
    %74 = vector.multi_reduction <maximumf>, %73, %cst_34 [2] : vector<2x8x8xf32> to vector<2x8xf32>
    %75 = vector.shape_cast %74 : vector<2x8xf32> to vector<2x8x1xf32>
    %76 = vector.broadcast %75 : vector<2x8x1xf32> to vector<2x8x8xf32>
    %77 = arith.subf %73, %76 : vector<2x8x8xf32>
    %78 = math.exp %77 : vector<2x8x8xf32>
    %cst_35 = arith.constant dense<0.000000e+00> : vector<2x8xf32>
    %79 = vector.multi_reduction <add>, %78, %cst_35 [2] : vector<2x8x8xf32> to vector<2x8xf32>
    %80 = vector.shape_cast %79 : vector<2x8xf32> to vector<2x8x1xf32>
    %81 = tpu.reciprocal %80 {approx = true} : vector<2x8x1xf32> -> vector<2x8x1xf32>
    %82 = vector.broadcast %81 : vector<2x8x1xf32> to vector<2x8x8xf32>
    %83 = arith.mulf %78, %82 : vector<2x8x8xf32>
    %84 = arith.truncf %83 : vector<2x8x8xf32> to vector<2x8x8xbf16>
    "tpu.trace_start"() <{level = 10 : i32, message = "bqk,bkd->bqd"}> : () -> ()
    %cst_36 = arith.constant dense<0.000000e+00> : vector<2x8x8xf32>
    %85 = tpu.matmul %84, %72, %cst_36 {dimension_numbers = #tpu.dot_dimension_numbers<[2], [1], [1], [2], [0, 0, 0, 1, 1, 2], [0], [0]>} : vector<2x8x8xbf16>, vector<2x8x8xbf16>, vector<2x8x8xf32> -> vector<2x8x8xf32>
    "tpu.trace_stop"() : () -> ()
    %86 = vector.shape_cast %85 : vector<2x8x8xf32> to vector<16x8xf32>
    %87 = arith.truncf %86 : vector<16x8xf32> to vector<16x8xbf16>
    %c0_37 = arith.constant 0 : index
    %c16 = arith.constant 16 : index
    %88 = vector.load %arg21[%c0_37, %c16] : memref<16x32xbf16, #tpu.memory_space<vmem>>, vector<16x8xbf16>
    tpu.vector_store %arg21[%c0_37, %c16], %87 {strides = array<i32>} : memref<16x32xbf16, #tpu.memory_space<vmem>>, vector<16x8xbf16>,
    %89 = vector.extract_strided_slice %13 {offsets = [0, 0, 24], sizes = [2, 8, 8], strides = [1, 1, 1]} : vector<2x8x32xbf16> to vector<2x8x8xbf16>
    %90 = vector.extract_strided_slice %22 {offsets = [0, 0, 24], sizes = [2, 8, 8], strides = [1, 1, 1]} : vector<2x8x32xbf16> to vector<2x8x8xbf16>
    %91 = vector.extract_strided_slice %31 {offsets = [0, 0, 24], sizes = [2, 8, 8], strides = [1, 1, 1]} : vector<2x8x32xbf16> to vector<2x8x8xbf16>
    "tpu.trace_start"() <{level = 10 : i32, message = "bqd,bkd->bqk"}> : () -> ()
    %cst_38 = arith.constant dense<0.000000e+00> : vector<2x8x8xf32>
    %92 = tpu.matmul %89, %90, %cst_38 {dimension_numbers = #tpu.dot_dimension_numbers<[2], [2], [1], [1], [0, 0, 0, 1, 1, 1], [0], [0]>} : vector<2x8x8xbf16>, vector<2x8x8xbf16>, vector<2x8x8xf32> -> vector<2x8x8xf32>
    "tpu.trace_stop"() : () -> ()
    %cst_39 = arith.constant dense<0xFF800000> : vector<2x8xf32>
    %93 = vector.multi_reduction <maximumf>, %92, %cst_39 [2] : vector<2x8x8xf32> to vector<2x8xf32>
    %94 = vector.shape_cast %93 : vector<2x8xf32> to vector<2x8x1xf32>
    %95 = vector.broadcast %94 : vector<2x8x1xf32> to vector<2x8x8xf32>
    %96 = arith.subf %92, %95 : vector<2x8x8xf32>
    %97 = math.exp %96 : vector<2x8x8xf32>
    %cst_40 = arith.constant dense<0.000000e+00> : vector<2x8xf32>
    %98 = vector.multi_reduction <add>, %97, %cst_40 [2] : vector<2x8x8xf32> to vector<2x8xf32>
    %99 = vector.shape_cast %98 : vector<2x8xf32> to vector<2x8x1xf32>
    %100 = tpu.reciprocal %99 {approx = true} : vector<2x8x1xf32> -> vector<2x8x1xf32>
    %101 = vector.broadcast %100 : vector<2x8x1xf32> to vector<2x8x8xf32>
    %102 = arith.mulf %97, %101 : vector<2x8x8xf32>
    %103 = arith.truncf %102 : vector<2x8x8xf32> to vector<2x8x8xbf16>
    "tpu.trace_start"() <{level = 10 : i32, message = "bqk,bkd->bqd"}> : () -> ()
    %cst_41 = arith.constant dense<0.000000e+00> : vector<2x8x8xf32>
    %104 = tpu.matmul %103, %91, %cst_41 {dimension_numbers = #tpu.dot_dimension_numbers<[2], [1], [1], [2], [0, 0, 0, 1, 1, 2], [0], [0]>} : vector<2x8x8xbf16>, vector<2x8x8xbf16>, vector<2x8x8xf32> -> vector<2x8x8xf32>
    "tpu.trace_stop"() : () -> ()
    %105 = vector.shape_cast %104 : vector<2x8x8xf32> to vector<16x8xf32>
    %106 = arith.truncf %105 : vector<16x8xf32> to vector<16x8xbf16>
    %c0_42 = arith.constant 0 : index
    %c24 = arith.constant 24 : index
    %107 = vector.load %arg21[%c0_42, %c24] : memref<16x32xbf16, #tpu.memory_space<vmem>>, vector<16x8xbf16>
    tpu.vector_store %arg21[%c0_42, %c24], %106 {strides = array<i32>} : memref<16x32xbf16, #tpu.memory_space<vmem>>, vector<16x8xbf16>,
    %c0_43 = arith.constant 0 : index
    %c0_44 = arith.constant 0 : index
    %108 = vector.load %arg21[%c0_43, %c0_44] : memref<16x32xbf16, #tpu.memory_space<vmem>>, vector<16x32xbf16>
    %c0_45 = arith.constant 0 : index
    %c0_46 = arith.constant 0 : index
    %c0_47 = arith.constant 0 : index
    %109 = vector.load %arg9[%c0_45, %c0_46, %c0_47] : memref<1x32x32xbf16, #tpu.memory_space<vmem>>, vector<1x32x32xbf16>
    %110 = vector.shape_cast %109 : vector<1x32x32xbf16> to vector<32x32xbf16>
    %cst_48 = arith.constant dense<0.000000e+00> : vector<16x32xf32>
    %111 = tpu.matmul %108, %110, %cst_48 {dimension_numbers = #tpu.dot_dimension_numbers<[1], [0], [0], [1], [0, 0, 1, 1], [], []>} : vector<16x32xbf16>, vector<32x32xbf16>, vector<16x32xf32> -> vector<16x32xf32>
    %c0_49 = arith.constant 0 : index
    %c0_50 = arith.constant 0 : index
    %c0_51 = arith.constant 0 : index
    %112 = vector.load %arg10[%c0_49, %c0_50, %c0_51] : memref<1x1x32xf32, #tpu.memory_space<vmem>>, vector<1x1x32xf32>
    %113 = vector.shape_cast %112 : vector<1x1x32xf32> to vector<1x32xf32>
    %114 = vector.broadcast %113 : vector<1x32xf32> to vector<16x32xf32>
    %115 = arith.addf %111, %114 : vector<16x32xf32>
    %116 = arith.addf %3, %115 : vector<16x32xf32>
    %cst_52 = arith.constant dense<0.000000e+00> : vector<16xf32>
    %117 = vector.multi_reduction <add>, %116, %cst_52 [1] : vector<16x32xf32> to vector<16xf32>
    %118 = vector.shape_cast %117 : vector<16xf32> to vector<16x1xf32>
    %cst_53 = arith.constant 3.200000e+01 : f32
    %119 = vector.broadcast %cst_53 : f32 to vector<16x1xf32>
    %120 = arith.divf %118, %119 : vector<16x1xf32>
    %121 = arith.mulf %116, %116 : vector<16x32xf32>
    %cst_54 = arith.constant dense<0.000000e+00> : vector<16xf32>
    %122 = vector.multi_reduction <add>, %121, %cst_54 [1] : vector<16x32xf32> to vector<16xf32>
    %123 = vector.shape_cast %122 : vector<16xf32> to vector<16x1xf32>
    %cst_55 = arith.constant 3.200000e+01 : f32
    %124 = vector.broadcast %cst_55 : f32 to vector<16x1xf32>
    %125 = arith.divf %123, %124 : vector<16x1xf32>
    %126 = arith.mulf %120, %120 : vector<16x1xf32>
    %127 = arith.subf %125, %126 : vector<16x1xf32>
    %cst_56 = arith.constant 0.000000e+00 : f32
    %128 = vector.broadcast %cst_56 : f32 to vector<16x1xf32>
    %129 = arith.maximumf %127, %128 : vector<16x1xf32>
    %c0_57 = arith.constant 0 : index
    %c0_58 = arith.constant 0 : index
    %c0_59 = arith.constant 0 : index
    %130 = vector.load %arg11[%c0_57, %c0_58, %c0_59] : memref<1x1x32xf32, #tpu.memory_space<vmem>>, vector<1x1x32xf32>
    %131 = vector.shape_cast %130 : vector<1x1x32xf32> to vector<1x32xf32>
    %132 = vector.broadcast %120 : vector<16x1xf32> to vector<16x32xf32>
    %133 = arith.subf %116, %132 : vector<16x32xf32>
    %cst_60 = arith.constant 9.99999996E-13 : f32
    %134 = vector.broadcast %cst_60 : f32 to vector<16x1xf32>
    %135 = arith.addf %129, %134 : vector<16x1xf32>
    %136 = math.rsqrt %135 : vector<16x1xf32>
    %137 = vector.broadcast %136 : vector<16x1xf32> to vector<16x32xf32>
    %138 = arith.mulf %133, %137 : vector<16x32xf32>
    %139 = vector.broadcast %131 : vector<1x32xf32> to vector<16x32xf32>
    %140 = arith.mulf %139, %138 : vector<16x32xf32>
    %c0_61 = arith.constant 0 : index
    %c0_62 = arith.constant 0 : index
    %c0_63 = arith.constant 0 : index
    %141 = vector.load %arg12[%c0_61, %c0_62, %c0_63] : memref<1x1x32xf32, #tpu.memory_space<vmem>>, vector<1x1x32xf32>
    %142 = vector.shape_cast %141 : vector<1x1x32xf32> to vector<1x32xf32>
    %143 = vector.broadcast %142 : vector<1x32xf32> to vector<16x32xf32>
    %144 = arith.addf %140, %143 : vector<16x32xf32>
    %145 = arith.truncf %144 : vector<16x32xf32> to vector<16x32xbf16>
    %c0_64 = arith.constant 0 : index
    %c0_65 = arith.constant 0 : index
    %c0_66 = arith.constant 0 : index
    %146 = vector.load %arg13[%c0_64, %c0_65, %c0_66] : memref<1x32x64xbf16, #tpu.memory_space<vmem>>, vector<1x32x64xbf16>
    %147 = vector.shape_cast %146 : vector<1x32x64xbf16> to vector<32x64xbf16>
    %cst_67 = arith.constant dense<0.000000e+00> : vector<16x64xf32>
    %148 = tpu.matmul %145, %147, %cst_67 {dimension_numbers = #tpu.dot_dimension_numbers<[1], [0], [0], [1], [0, 0, 1, 1], [], []>} : vector<16x32xbf16>, vector<32x64xbf16>, vector<16x64xf32> -> vector<16x64xf32>
    %c0_68 = arith.constant 0 : index
    %c0_69 = arith.constant 0 : index
    %c0_70 = arith.constant 0 : index
    %149 = vector.load %arg14[%c0_68, %c0_69, %c0_70] : memref<1x1x64xf32, #tpu.memory_space<vmem>>, vector<1x1x64xf32>
    %150 = vector.shape_cast %149 : vector<1x1x64xf32> to vector<1x64xf32>
    %151 = vector.broadcast %150 : vector<1x64xf32> to vector<16x64xf32>
    %152 = arith.addf %148, %151 : vector<16x64xf32>
    %153 = arith.truncf %152 : vector<16x64xf32> to vector<16x64xbf16>
    %cst_71 = arith.constant 0.000000e+00 : bf16
    %154 = vector.broadcast %cst_71 : bf16 to vector<16x64xbf16>
    %155 = arith.maximumf %153, %154 : vector<16x64xbf16>
    %c0_72 = arith.constant 0 : index
    %c0_73 = arith.constant 0 : index
    %c0_74 = arith.constant 0 : index
    %156 = vector.load %arg15[%c0_72, %c0_73, %c0_74] : memref<1x64x32xbf16, #tpu.memory_space<vmem>>, vector<1x64x32xbf16>
    %157 = vector.shape_cast %156 : vector<1x64x32xbf16> to vector<64x32xbf16>
    %cst_75 = arith.constant dense<0.000000e+00> : vector<16x32xf32>
    %158 = tpu.matmul %155, %157, %cst_75 {dimension_numbers = #tpu.dot_dimension_numbers<[1], [0], [0], [1], [0, 0, 1, 1], [], []>} : vector<16x64xbf16>, vector<64x32xbf16>, vector<16x32xf32> -> vector<16x32xf32>
    %c0_76 = arith.constant 0 : index
    %c0_77 = arith.constant 0 : index
    %c0_78 = arith.constant 0 : index
    %159 = vector.load %arg16[%c0_76, %c0_77, %c0_78] : memref<1x1x32xf32, #tpu.memory_space<vmem>>, vector<1x1x32xf32>
    %160 = vector.shape_cast %159 : vector<1x1x32xf32> to vector<1x32xf32>
    %161 = vector.broadcast %160 : vector<1x32xf32> to vector<16x32xf32>
    %162 = arith.addf %158, %161 : vector<16x32xf32>
    %163 = arith.addf %144, %162 : vector<16x32xf32>
    %cst_79 = arith.constant dense<0.000000e+00> : vector<16xf32>
    %164 = vector.multi_reduction <add>, %163, %cst_79 [1] : vector<16x32xf32> to vector<16xf32>
    %165 = vector.shape_cast %164 : vector<16xf32> to vector<16x1xf32>
    %cst_80 = arith.constant 3.200000e+01 : f32
    %166 = vector.broadcast %cst_80 : f32 to vector<16x1xf32>
    %167 = arith.divf %165, %166 : vector<16x1xf32>
    %168 = arith.mulf %163, %163 : vector<16x32xf32>
    %cst_81 = arith.constant dense<0.000000e+00> : vector<16xf32>
    %169 = vector.multi_reduction <add>, %168, %cst_81 [1] : vector<16x32xf32> to vector<16xf32>
    %170 = vector.shape_cast %169 : vector<16xf32> to vector<16x1xf32>
    %cst_82 = arith.constant 3.200000e+01 : f32
    %171 = vector.broadcast %cst_82 : f32 to vector<16x1xf32>
    %172 = arith.divf %170, %171 : vector<16x1xf32>
    %173 = arith.mulf %167, %167 : vector<16x1xf32>
    %174 = arith.subf %172, %173 : vector<16x1xf32>
    %cst_83 = arith.constant 0.000000e+00 : f32
    %175 = vector.broadcast %cst_83 : f32 to vector<16x1xf32>
    %176 = arith.maximumf %174, %175 : vector<16x1xf32>
    %c0_84 = arith.constant 0 : index
    %c0_85 = arith.constant 0 : index
    %c0_86 = arith.constant 0 : index
    %177 = vector.load %arg17[%c0_84, %c0_85, %c0_86] : memref<1x1x32xf32, #tpu.memory_space<vmem>>, vector<1x1x32xf32>
    %178 = vector.shape_cast %177 : vector<1x1x32xf32> to vector<1x32xf32>
    %179 = vector.broadcast %167 : vector<16x1xf32> to vector<16x32xf32>
    %180 = arith.subf %163, %179 : vector<16x32xf32>
    %cst_87 = arith.constant 9.99999996E-13 : f32
    %181 = vector.broadcast %cst_87 : f32 to vector<16x1xf32>
    %182 = arith.addf %176, %181 : vector<16x1xf32>
    %183 = math.rsqrt %182 : vector<16x1xf32>
    %184 = vector.broadcast %183 : vector<16x1xf32> to vector<16x32xf32>
    %185 = arith.mulf %180, %184 : vector<16x32xf32>
    %186 = vector.broadcast %178 : vector<1x32xf32> to vector<16x32xf32>
    %187 = arith.mulf %186, %185 : vector<16x32xf32>
    %c0_88 = arith.constant 0 : index
    %c0_89 = arith.constant 0 : index
    %c0_90 = arith.constant 0 : index
    %188 = vector.load %arg18[%c0_88, %c0_89, %c0_90] : memref<1x1x32xf32, #tpu.memory_space<vmem>>, vector<1x1x32xf32>
    %189 = vector.shape_cast %188 : vector<1x1x32xf32> to vector<1x32xf32>
    %190 = vector.broadcast %189 : vector<1x32xf32> to vector<16x32xf32>
    %191 = arith.addf %187, %190 : vector<16x32xf32>
    %c0_91 = arith.constant 0 : index
    %c0_92 = arith.constant 0 : index
    %192 = vector.load %arg20[%c0_91, %c0_92] : memref<16x32xf32, #tpu.memory_space<vmem>>, vector<16x32xf32>
    tpu.vector_store %arg20[%c0_91, %c0_92], %191 {strides = array<i32>} : memref<16x32xf32, #tpu.memory_space<vmem>>, vector<16x32xf32>,
    %c1_i32 = arith.constant 1 : i32
    %193 = arith.cmpi eq, %arg1, %c1_i32 : i32
    %194 = arith.extui %193 : i1 to i32
    %c0_i32_93 = arith.constant 0 : i32
    %195 = arith.cmpi ne, %194, %c0_i32_93 : i32
    scf.if %195 {
      %196 = vector.shape_cast %191 : vector<16x32xf32> to vector<2x8x32xf32>
      %c0_94 = arith.constant 0 : index
      %c0_95 = arith.constant 0 : index
      %c0_96 = arith.constant 0 : index
      %197 = vector.load %arg19[%c0_94, %c0_95, %c0_96] : memref<2x8x32xf32, #tpu.memory_space<vmem>>, vector<2x8x32xf32>
      tpu.vector_store %arg19[%c0_94, %c0_95, %c0_96], %196 {strides = array<i32>} : memref<2x8x32xf32, #tpu.memory_space<vmem>>, vector<2x8x32xf32>,
    } else {
    }
    return
  }
  func.func @transform_0(%arg0: i32, %arg1: i32) -> (i32, i32, i32) {
    %c0_i32 = arith.constant 0 : i32
    %c0_i32_0 = arith.constant 0 : i32
    %c0_i32_1 = arith.constant 0 : i32
    return %arg0, %c0_i32, %c0_i32_0 : i32, i32, i32
  }
  func.func @transform_1(%arg0: i32, %arg1: i32) -> (i32, i32, i32) {
    %c0_i32 = arith.constant 0 : i32
    %c0_i32_0 = arith.constant 0 : i32
    %c0_i32_1 = arith.constant 0 : i32
    return %arg1, %c0_i32, %c0_i32_0 : i32, i32, i32
  }
  func.func @transform_2(%arg0: i32, %arg1: i32) -> (i32, i32, i32) {
    %c0_i32 = arith.constant 0 : i32
    %c0_i32_0 = arith.constant 0 : i32
    %c0_i32_1 = arith.constant 0 : i32
    return %arg1, %c0_i32, %c0_i32_0 : i32, i32, i32
  }
  func.func @transform_3(%arg0: i32, %arg1: i32) -> (i32, i32, i32) {
    %c0_i32 = arith.constant 0 : i32
    %c0_i32_0 = arith.constant 0 : i32
    %c0_i32_1 = arith.constant 0 : i32
    return %arg1, %c0_i32, %c0_i32_0 : i32, i32, i32
  }
  func.func @transform_4(%arg0: i32, %arg1: i32) -> (i32, i32, i32) {
    %c0_i32 = arith.constant 0 : i32
    %c0_i32_0 = arith.constant 0 : i32
    %c0_i32_1 = arith.constant 0 : i32
    return %arg1, %c0_i32, %c0_i32_0 : i32, i32, i32
  }
  func.func @transform_5(%arg0: i32, %arg1: i32) -> (i32, i32, i32) {
    %c0_i32 = arith.constant 0 : i32
    %c0_i32_0 = arith.constant 0 : i32
    %c0_i32_1 = arith.constant 0 : i32
    return %arg1, %c0_i32, %c0_i32_0 : i32, i32, i32
  }
  func.func @transform_6(%arg0: i32, %arg1: i32) -> (i32, i32, i32) {
    %c0_i32 = arith.constant 0 : i32
    %c0_i32_0 = arith.constant 0 : i32
    %c0_i32_1 = arith.constant 0 : i32
    return %arg1, %c0_i32, %c0_i32_0 : i32, i32, i32
  }
  func.func @transform_7(%arg0: i32, %arg1: i32) -> (i32, i32, i32) {
    %c0_i32 = arith.constant 0 : i32
    %c0_i32_0 = arith.constant 0 : i32
    %c0_i32_1 = arith.constant 0 : i32
    return %arg1, %c0_i32, %c0_i32_0 : i32, i32, i32
  }
  func.func @transform_8(%arg0: i32, %arg1: i32) -> (i32, i32, i32) {
    %c0_i32 = arith.constant 0 : i32
    %c0_i32_0 = arith.constant 0 : i32
    %c0_i32_1 = arith.constant 0 : i32
    return %arg1, %c0_i32, %c0_i32_0 : i32, i32, i32
  }
  func.func @transform_9(%arg0: i32, %arg1: i32) -> (i32, i32, i32) {
    %c0_i32 = arith.constant 0 : i32
    %c0_i32_0 = arith.constant 0 : i32
    %c0_i32_1 = arith.constant 0 : i32
    return %arg1, %c0_i32, %c0_i32_0 : i32, i32, i32
  }
  func.func @transform_10(%arg0: i32, %arg1: i32) -> (i32, i32, i32) {
    %c0_i32 = arith.constant 0 : i32
    %c0_i32_0 = arith.constant 0 : i32
    %c0_i32_1 = arith.constant 0 : i32
    return %arg1, %c0_i32, %c0_i32_0 : i32, i32, i32
  }
  func.func @transform_11(%arg0: i32, %arg1: i32) -> (i32, i32, i32) {
    %c0_i32 = arith.constant 0 : i32
    %c0_i32_0 = arith.constant 0 : i32
    %c0_i32_1 = arith.constant 0 : i32
    return %arg1, %c0_i32, %c0_i32_0 : i32, i32, i32
  }
  func.func @transform_12(%arg0: i32, %arg1: i32) -> (i32, i32, i32) {
    %c0_i32 = arith.constant 0 : i32
    %c0_i32_0 = arith.constant 0 : i32
    %c0_i32_1 = arith.constant 0 : i32
    return %arg1, %c0_i32, %c0_i32_0 : i32, i32, i32
  }
  func.func @transform_13(%arg0: i32, %arg1: i32) -> (i32, i32, i32) {
    %c0_i32 = arith.constant 0 : i32
    %c0_i32_0 = arith.constant 0 : i32
    %c0_i32_1 = arith.constant 0 : i32
    return %arg1, %c0_i32, %c0_i32_0 : i32, i32, i32
  }
  func.func @transform_14(%arg0: i32, %arg1: i32) -> (i32, i32, i32) {
    %c0_i32 = arith.constant 0 : i32
    %c0_i32_0 = arith.constant 0 : i32
    %c0_i32_1 = arith.constant 0 : i32
    return %arg1, %c0_i32, %c0_i32_0 : i32, i32, i32
  }
  func.func @transform_15(%arg0: i32, %arg1: i32) -> (i32, i32, i32) {
    %c0_i32 = arith.constant 0 : i32
    %c0_i32_0 = arith.constant 0 : i32
    %c0_i32_1 = arith.constant 0 : i32
    return %arg1, %c0_i32, %c0_i32_0 : i32, i32, i32
  }
  func.func @transform_16(%arg0: i32, %arg1: i32) -> (i32, i32, i32) {
    %c0_i32 = arith.constant 0 : i32
    %c0_i32_0 = arith.constant 0 : i32
    %c0_i32_1 = arith.constant 0 : i32
    return %arg1, %c0_i32, %c0_i32_0 : i32, i32, i32
  }
  func.func @transform_17(%arg0: i32, %arg1: i32) -> (i32, i32, i32) {
    %c0_i32 = arith.constant 0 : i32
    %c0_i32_0 = arith.constant 0 : i32
    %c0_i32_1 = arith.constant 0 : i32
    return %arg0, %c0_i32, %c0_i32_0 : i32, i32, i32
  }
}

</mosaic_0001>

<bundles_post_ra>
// kernel: tpu_custom_call.1
= control target key start
LH: loop header
LB: loop body
LE: loop exit
PB: predicated region body
PF: predicated region fallthrough
CT: control target
= control target key end

     0   :  { %s3855_s0 = inlined_call_operand.hbm [shape: f32[2,8,32], index: 0, kind: input, shape index: {}]   ;;  %s3856_s1 = inlined_call_operand.vmem [shape: bf16[2,32,32], index: 1, kind: input, shape index: {}]   ;;  %s3857_s2 = inlined_call_operand.vmem [shape: f32[2,1,32], index: 2, kind: input, shape index: {}]   ;;  %s3858_s3 = inlined_call_operand.vmem [shape: bf16[2,32,32], index: 3, kind: input, shape index: {}]   ;;  %s3859_s4 = inlined_call_operand.vmem [shape: f32[2,1,32], index: 4, kind: input, shape index: {}]   ;;  %s3860_s5 = inlined_call_operand.vmem [shape: bf16[2,32,32], index: 5, kind: input, shape index: {}]   ;;  %s3861_s6 = inlined_call_operand.vmem [shape: f32[2,1,32], index: 6, kind: input, shape index: {}]   ;;  %s3862_s7 = inlined_call_operand.hbm [shape: bf16[2,32,32], index: 7, kind: input, shape index: {}]   ;;  %s3863_s8 = inlined_call_operand.vmem [shape: f32[2,1,32], index: 8, kind: input, shape index: {}]   ;;  %s3864_s9 = inlined_call_operand.vmem [shape: f32[2,1,32], index: 9, kind: input, shape index: {}]   ;;  %s3865_s10 = inlined_call_operand.vmem [shape: f32[2,1,32], index: 10, kind: input, shape index: {}]   ;;  %s3866_s11 = inlined_call_operand.hbm [shape: bf16[2,32,64], index: 11, kind: input, shape index: {}]   ;;  %s3867_s12 = inlined_call_operand.vmem [shape: f32[2,1,64], index: 12, kind: input, shape index: {}]   ;;  %s3868_s13 = inlined_call_operand.vmem [shape: bf16[2,64,32], index: 13, kind: input, shape index: {}]   ;;  %s3869_s14 = inlined_call_operand.vmem [shape: f32[2,1,32], index: 14, kind: input, shape index: {}]   ;;  %s3870_s15 = inlined_call_operand.vmem [shape: f32[2,1,32], index: 15, kind: input, shape index: {}]   ;;  %s3871_s16 = inlined_call_operand.vmem [shape: f32[2,1,32], index: 16, kind: input, shape index: {}]   ;;  %s3872_s17 = inlined_call_operand.hbm [shape: f32[2,8,32], index: 17, kind: output, shape index: {}]  }
   0x1   :  { %3889 = sst [smem:[#allocation21_spill]] %s3855_s0 }
   0x2   :  { %3890 = sst [smem:[#allocation22_spill]] %s3856_s1 }
   0x3   :  { %3891 = sst [smem:[#allocation23_spill]] %s3858_s3 }
   0x4   :  { %3892 = sst [smem:[#allocation24_spill]] %s3860_s5 }
   0x5   :  { %3893 = sst [smem:[#allocation25_spill]] %s3862_s7 }
   0x6   :  { %3894 = sst [smem:[#allocation26_spill]] %s3864_s9 }
   0x7   :  { %3895 = sst [smem:[#allocation27_spill]] %s3865_s10 }
   0x8   :  { %3896 = sst [smem:[#allocation28_spill]] %s3866_s11 }
   0x9   :  { %3897 = sst [smem:[#allocation29_spill]] %s3869_s14 }
   0xa   :  { %3898 = sst [smem:[#allocation30_spill]] %s3870_s15 }
   0xb   :  { %3899 = sst [smem:[#allocation31_spill]] %s3871_s16 }
   0xc   :  { %3900 = sst [smem:[#allocation32_spill]] %s3872_s17 }
   0xd   :  { %22 = vsyncpa [#allocation5], 0 }
   0xe   :  { %23 = vsyncpa [#allocation8], 0 }
   0xf   :  { %25 = vsyncpa [#allocation8 + $0x1], 0 }
  0x10   :  { %26 = vsyncpa [#allocation6], 0  ;;  %s3274_s24 = smov 0   ;;  %s3276_s25 = smov 0  }
  0x11   :  { %s3278_s26 = smov 0   ;;  %s3280_s27 = smov 0  }
  0x12   :  { %s3282_s28 = smov 0   ;;  %s3284_s29 = smov 0  }
  0x13 LB: > { %3901 = sst [smem:[#allocation14_spill]] %s3148_s25  ;;  %s41_s0 = sadd.s32 1, %s3160_s28  ;;  %s3164_s29 = sphi %s3284_s29, %s32_s29   ;;  %s3160_s28 = sphi %s3282_s28, %s3951_s28   ;;  %s3156_s27 = sphi %s3280_s27, %s3950_s27   ;;  %s3152_s26 = sphi %s3278_s26, %s3949_s26   ;;  %s3148_s25 = sphi %s3276_s25, %s3948_s25   ;;  %s3144_s24 = sphi %s3274_s24, %s3947_s24  }
  0x14   : > { %3902 = sst [smem:[#allocation15_spill]] %s3152_s26  ;;  %s233_s30 = sadd.s32 1, %s3152_s26 }
  0x15   : > { %3903 = sst [smem:[#allocation16_spill]] %s3160_s28  ;;  %p42_p0 = scmp.ge.s32.totalorder %s41_s0, 2 }
  0x16   : > { %3904 = sst [smem:[#allocation17_spill]] %s3164_s29  ;;  %p240_p1 = scmp.ne.s32.totalorder %s3152_s26, %s3148_s25 }
  0x17   : > { %p241_p2 = scmp.eq.s32.totalorder %s3164_s29, 0  ;;  %s3953_s0 = smov (%p42_p0, %s41_s0), 0 }
  0x18   : > { %3905 = sst [smem:[#allocation18_spill]] %s3953_s0  ;;  %p2870_p4 = scmp.lt.s32.totalorder %s3164_s29, 2 }
  0x19   : > { %p242_p3 = por %p241_p2, %p240_p1  ;;  %s230_s18 = ssub.s32 %s3160_s28, %s3953_s0 }
  0x1a   : > { %s588_s19 = sand.u32 1, %s3164_s29   ;;  %p231_p5 = scmp.eq.s32.totalorder %s230_s18, 0 }
  0x1b   : > { %s590_s1 = sand.u32 1, %s3152_s26   ;;  %s3876_s20 = sshll.u32 %s3160_s28, 8 }
  0x1c   : > { %s3318_s21 = scalar_select %p231_p5, %s3152_s26, %s233_s30  }
  0x1d   : > { %s3320_s22 = sshll.u32 %s590_s1, 4  ;;  %s3907_s7 = sld [smem:[#allocation25_spill]] }
  0x1e   : > { %3906 = sst [smem:[#allocation19_spill]] %s3318_s21  ;;  %p3329_p6 = pnand %p2870_p4, %p242_p3 }
  0x1f   : > { %s592_s30 = scalar_lea.vmem [#allocation7], %s3320_s22  ;;  %s3336_s1 = scalar_lea.sflag [#allocation8], %s588_s19 }
  0x20   : > { %s599_s18 = sshll.u32 %s592_s30, 4  ;;  %p2994_p8 = pneg %p3329_p6  ;;  %s3334_s18 = int_to_ptr.vmem [resolvable:$true] %s599_s18 }
  0x23   : > { %s3327_s16 = scalar_lea.hbm %s3907_s7, %s3876_s20  ;;  %s2997_s21 = scalar_lea.hbm %s3907_s7, 512 }
  0x24   : > { %s2992_s17 = scalar_lea.hbm %s3327_s16, 256  ;;  %p2998_p11 = scmp.lt.u32.totalorder %s3327_s16, %s3907_s7 }
  0x25   : > { %p2993_p7 = scmp.ne.s32.totalorder %s3327_s16, %s2992_s17  ;;  %p2999_p12 = scmp.lt.u32.totalorder %s2997_s21, %s2992_s17 }
  0x26   : > { %p3001_p0 = scmp.lt.u32.totalorder %s2992_s17, %s3327_s16 }
  0x27   : > { %p2995_p9 = pnand %p2994_p8, %p2993_p7  ;;  %p3000_p13 = por %p2999_p12, %p2998_p11 }
  0x29   : > { %p2996_p10 = pneg %p2995_p9  ;;  %p3002_p1 = por %p3001_p0, %p3000_p13 }
  0x2b   : > { %p3003_p2 = pnand %p3002_p1, %p2996_p10 }
  0x2d   : > { %3006 = shalt.err (!%p3003_p2)
}
  0x2e   : > { %s3007_s19 = scalar_lea.vmem %s3334_s18, 256  ;;  %s3166_s20 = smov [#allocation7]  }
  0x2f   : > { %p3008_p3 = scmp.ne.s32.totalorder %s3334_s18, %s3007_s19  ;;  %s3012_s30 = sshll.u32 %s3166_s20, 4  ;;  %s3013_s30 = int_to_ptr.vmem [resolvable:$false] %s3012_s30 }
  0x30   : > { %s3014_s15 = scalar_lea.vmem %s3013_s30, 512  ;;  %p3015_p7 = scmp.lt.s32.totalorder %s3334_s18, %s3013_s30 }
  0x31   : > { %p3010_p4 = pnand %p3008_p3, %p2994_p8  ;;  %p3016_p9 = scmp.lt.s32.totalorder %s3014_s15, %s3007_s19 }
  0x33   : > { %p3011_p5 = pneg %p3010_p4  ;;  %p3017_p11 = por %p3016_p9, %p3015_p7 }
  0x35   : > { %p3018_p12 = pnand %p3017_p11, %p3011_p5 }
  0x37   : > { %3021 = shalt.err (!%p3018_p12)
}
  0x38   : > { %s3878_s26 = smov 64   ;;  %s3879_s21 = smov 4  }
  0x39   : > { %2865 = dma.hbm_to_vmem [thread:$0]  (!%p3329_p6), %s3327_s16, 256, %s3334_s18, %s3336_s1, %s3878_s26, %s3878_s26, %s3879_s21  }
  0x3a   : > { %s631_s17 = scalar_lea.vmem [#allocation9], %s3320_s22  ;;  %s3369_s19 = sadd.s32 4294967295, %s3164_s29  }
  0x3b   : > { %s638_s23 = sshll.u32 %s631_s17, 4  ;;  %3909 = sst [smem:[#allocation20_spill]] %s3369_s19  ;;  %s3393_s23 = int_to_ptr.vmem [resolvable:$true] %s638_s23 }
  0x3c   : > { %p246_p10 = scmp.ne.s32.totalorder %s3148_s25, %s3144_s24  ;;  %p3880_p13 = scmp.eq.s32.totalorder %s3369_s19, 0 }
  0x3d   : > { %p2555_p0 = scmp.ge.s32.totalorder %s3164_s29, 1  ;;  %p517_p1 = scmp.lt.s32.totalorder %s3164_s29, 3 }
  0x3e   : > { %p3378_p2 = por %p3880_p13, %p246_p10  ;;  %s3912_s16 = sshll.u32 %s3160_s28, 8 }
  0x3f   : > { %p3382_p3 = pnand %p2555_p0, %p517_p1  ;;  %s3913_s11 = sld [smem:[#allocation28_spill]] }
  0x40   : > { %s3910_s20 = scalar_select %p3378_p2, 1, 0 }
  0x41   : > { %s3911_s30 = scalar_select %p3382_p3, 1, 0 }
  0x42   : > { %s3169_s24 = smov [#allocation4]   ;;  %p2858_p4 = pneg %p3382_p3 }
  0x43   : > { %s532_s17 = sshll.u32 %s3169_s24, 4  ;;  %s3397_s17 = int_to_ptr.vmem [resolvable:$true] %s532_s17 }
  0x44   : > { %p3401_p5 = pnand %p2858_p4, %p3880_p13 }
  0x45   : > { %s3391_s15 = scalar_lea.hbm %s3913_s11, %s3912_s16  ;;  %s3027_s24 = scalar_lea.hbm %s3913_s11, 512 }
  0x46   : > { %s3022_s22 = scalar_lea.hbm %s3391_s15, 256  ;;  %p3028_p12 = scmp.lt.u32.totalorder %s3391_s15, %s3913_s11 }
  0x47   : > { %p3023_p7 = scmp.ne.s32.totalorder %s3391_s15, %s3022_s22  ;;  %p3029_p10 = scmp.lt.u32.totalorder %s3027_s24, %s3022_s22 }
  0x48   : > { %p3031_p1 = scmp.lt.u32.totalorder %s3022_s22, %s3391_s15 }
  0x49   : > { %p3025_p9 = pnand %p3023_p7, %p2994_p8  ;;  %p3030_p0 = por %p3029_p10, %p3028_p12 }
  0x4b   : > { %p3026_p11 = pneg %p3025_p9  ;;  %p3032_p4 = por %p3031_p1, %p3030_p0 }
  0x4d   : > { %p3033_p13 = pnand %p3032_p4, %p3026_p11 }
  0x4f   : > { %3036 = shalt.err (!%p3033_p13)
}
  0x50   : > { %s3037_s28 = scalar_lea.vmem %s3393_s23, 256  ;;  %s3170_s16 = smov [#allocation9]  }
  0x51   : > { %p3038_p7 = scmp.ne.s32.totalorder %s3393_s23, %s3037_s28  ;;  %s3042_s18 = sshll.u32 %s3170_s16, 4  ;;  %s3043_s18 = int_to_ptr.vmem [resolvable:$false] %s3042_s18 }
  0x52   : > { %s3044_s7 = scalar_lea.vmem %s3043_s18, 512  ;;  %p3045_p3 = scmp.lt.s32.totalorder %s3393_s23, %s3043_s18 }
  0x53   : > { %p3040_p9 = pnand %p3038_p7, %p2994_p8  ;;  %p3046_p12 = scmp.lt.s32.totalorder %s3044_s7, %s3037_s28 }
  0x55   : > { %p3041_p2 = pneg %p3040_p9  ;;  %p3047_p10 = por %p3046_p12, %p3045_p3 }
  0x57   : > { %p3048_p0 = pnand %p3047_p10, %p3041_p2 }
  0x59   : > { %3051 = shalt.err (!%p3048_p0)
}
  0x5a   : > { %s3915_s21 = smov 4   ;;  %s3916_s22 = smov 64  }
  0x5b   : > { %2868 = dma.hbm_to_vmem [thread:$0]  (!%p3329_p6), %s3391_s15, 256, %s3393_s23, %s3336_s1, %s3916_s22, %s3916_s22, %s3915_s21  }
  0x5c   : > { %s3917_s16 = sld [smem:[#allocation21_spill]]  ;;  %p3054_p13 = pneg %p3401_p5 }
  0x62   : > { %s3052_s29 = scalar_lea.hbm %s3917_s16, 256 }
  0x63   : > { %p3053_p8 = scmp.ne.s32.totalorder %s3917_s16, %s3052_s29  ;;  %p3059_p11 = scmp.lt.u32.totalorder %s3052_s29, %s3917_s16 }
  0x65   : > { %p3055_p2 = pnand %p3054_p13, %p3053_p8 }
  0x67   : > { %p3056_p3 = pneg %p3055_p2 }
  0x69   : > { %p3061_p1 = pnand %p3059_p11, %p3056_p3 }
  0x6b   : > { %3064 = shalt.err (!%p3061_p1)
}
  0x6c   : > { %s3065_s1 = scalar_lea.vmem %s3397_s17, 256  ;;  %p3073_p9 = scmp.lt.s32.totalorder %s3397_s17, %s3397_s17 }
  0x6d   : > { %p3066_p6 = scmp.ne.s32.totalorder %s3397_s17, %s3065_s1  ;;  %p3074_p12 = scmp.lt.s32.totalorder %s3065_s1, %s3065_s1 }
  0x6f   : > { %p3068_p4 = pnand %p3066_p6, %p3054_p13  ;;  %p3075_p10 = por %p3074_p12, %p3073_p9 }
  0x71   : > { %p3069_p7 = pneg %p3068_p4 }
  0x73   : > { %p3076_p0 = pnand %p3075_p10, %p3069_p7 }
  0x75   : > { %3079 = shalt.err (!%p3076_p0)
}
  0x76   : > { %s3171_s11 = smov 128   ;;  %s3172_s14 = smov 8  }
  0x77   : > { %2861 = dma.hbm_to_vmem [thread:$0]  (!%p3401_p5), %s3917_s16, 256, %s3397_s17, [#allocation5], %s3171_s11, %s3171_s11, %s3172_s14  }
  0x78   : > { %p3918_p8 = scmp.ne.s32.totalorder %s3911_s30, 0 }
  0x79   : > { %p3919_p13 = scmp.eq.s32.totalorder (!%p3918_p8), %s3369_s19, 0 }
  0x7a   : > { %682 = sbr.rel (%p3918_p8) target bundleno = 3906 (0xf42), region = 88 }
  0x81   : > { %3131 = dma.done.wait (%p3919_p13), [#allocation5], 256   ;;  %p3920_p2 = pmov %p3919_p13 }
  0x82   : > { %s688_s15 = sand.u32 1, %s3369_s19   ;;  %s690_s7 = sand.u32 1, %s3148_s25  }
  0x83   : > { %3133 = vsyncadd (%p3920_p2), [#allocation5], 4294967040  ;;  %s3461_s21 = sshll.u32 %s690_s7, 4  ;;  %s689_s26 = scalar_lea.sflag [#allocation8], %s688_s15 }
  0x84   : > { %p3921_p5 = scmp.ne.s32.totalorder %s3910_s20, 0 }
  0x86   : > { %3135 = dma.done.wait (%p3921_p5), %s689_s26, 512  }
  0x87   : > { %3137 = vsyncadd (%p3921_p5), %s689_s26, 4294966784  ;;  %p803_p3 = scmp.lt.s32.totalorder %s3156_s27, 1  ;;  %s3922_s1 = sld [smem:[#allocation22_spill]] }
  0x88   : > { %s3923_s3 = sld [smem:[#allocation23_spill]]  ;;  %s3924_s5 = sld [smem:[#allocation24_spill]] }
  0x89   : > { %s3470_s30 = scalar_select %p803_p3, %s3156_s27, 1 }
  0x8a   : > { %s3928_s29 = sld [smem:[#allocation30_spill]]  ;;  %s3929_s7 = sld [smem:[#allocation31_spill]] }
  0x8b   : > { %s2636_s17 = sshll.u32 %s3470_s30, 4  ;;  %s838_s22 = scalar_lea.vmem %s3867_s12, %s3470_s30 }
  0x8c   : > { %s701_s26 = scalar_lea.vmem [#allocation9], %s3461_s21  ;;  %p2576_p11 = scmp.ne.s32.totalorder %s3156_s27, 0 }
  0x8d   : > { %s3480_s11 = scalar_lea.vmem %s3922_s1, %s2636_s17  ;;  %s3927_s1 = sld [smem:[#allocation29_spill]]  ;;  %v859_v0 = vld [vmem:[#allocation4] sm:$0xff] (!%p2576_p11)  ;;  %vm861_vm0 = vcmask (!%p2576_p11), 261120   ;;  %v860_v1 = vld [vmem:[#allocation4 + $0x8] sm:$0xff] (!%p2576_p11) }
  0x8e   : > { %s815_s23 = scalar_lea.vmem %s3923_s3, %s2636_s17  ;;  %s3492_s25 = scalar_lea.vmem %s3924_s5, %s2636_s17  ;;  %862 = vst.msk [vmem:[#allocation2] sm:$0xff] (!%p2576_p11), %vm861_vm0, %v859_v0  ;;  %863 = vst.msk [vmem:[#allocation2 + $0x8] sm:$0xff] (!%p2576_p11), %vm861_vm0, %v860_v1 }
  0x8f   : > { %s2639_s17 = sshll.u32 %s3470_s30, 5  ;;  %858 = sbr.rel (%p2576_p11) target bundleno = 150 (0x96), region = 104 }
  0x90   : > { %s3518_s24 = scalar_lea.vmem %s3868_s13, %s2639_s17  ;;  %s849_s9 = scalar_lea.vmem %s3928_s29, %s3470_s30 }
  0x91   : > { %s852_s10 = scalar_lea.vmem %s3929_s7, %s3470_s30 }
  0x93   : > { %s846_s18 = scalar_lea.vmem %s3927_s1, %s3470_s30 }
  0x96 PF: > { %v2938_v2 = vld [vmem:[%s815_s23] sm:$0xff]   ;;  %v3173_v3 = vmov 0.0   ;;  %v2939_v4 = vld [vmem:[%s815_s23 + $0x8] sm:$0xff]   ;;  %vm3174_vm1 = vmmov 0   ;;  %vm890_vm2 = vcmask 261120   ;;  %s3930_s23 = scalar_lea.vmem %s3859_s4, %s3470_s30  ;;  %s3931_s29 = scalar_lea.vmem %s3857_s2, %s3470_s30  ;;  %vm1081_vm3 = vcmask 64512  }
  0x97   : > { %2706 = vmatprep.subr.bf16.mxu1 %v3173_v3  ;;  %2698 = vmatprep.subr.bf16.mxu0 %v3173_v3  ;;  %v2940_v5 = vld [vmem:[%s3480_s11] sm:$0xff]   ;;  %v3542_v7 = vld [vmem:[#allocation2 + $0x8] sm:$0xff]  ;;  %s3175_s7 = smov 120   ;;  %s3932_s20 = scalar_lea.vmem %s3861_s6, %s3470_s30  ;;  %vm1201_vm4 = vcmask 1043456   ;;  %vm1518_vm5 = vcmask 130112   ;;  %vm1745_vm6 = vcmask 195712  }
  0x98   : > { %2707 = vmatpush3.bf16.msra.mxu1 %v2938_v2  ;;  %2710 = vmatprep.mubr.msk.bf16.mxu1 %vm3174_vm1, %v3173_v3  ;;  %v3540_v6 = vld [vmem:[#allocation2] sm:$0xff]  ;;  %v2941_v8 = vld [vmem:[%s3480_s11 + $0x8] sm:$0xff]   ;;  %s3176_s28 = smov 112   ;;  %s3177_s0 = smov 104   ;;  %vm1972_vm7 = vcmask 261312   ;;  %vm2204_vm8 = vcmask 523264  }
  0x99   : > { %2708 = vmatprep.subr.bf16.mxu1 %v3173_v3  ;;  %2702 = vmatprep.mubr.msk.bf16.mxu0 %vm3174_vm1, %v3173_v3  ;;  %v866_v9 = vpack.c.bf16 %v3542_v7, %v3540_v6  ;;  %v2942_v10 = vld [vmem:[%s3492_s25] sm:$0xff]   ;;  %v2943_v11 = vld [vmem:[%s3492_s25 + $0x8] sm:$0xff]   ;;  %s3178_s19 = smov 8   ;;  %s3179_s14 = smov 16  }
  0x9a   : > { %2699 = vmatpush3.bf16.msra.mxu0 %v2940_v5  ;;  %v2583_v12 = vld [vmem:[%s3930_s23] ss:$0 sm:$0xff]  ;;  %s3933_s3 = scalar_lea.vmem [#allocation7], %s3461_s21  ;;  %s3180_s5 = smov 24  }
  0x9b   : > { %2700 = vmatprep.subr.bf16.mxu0 %v3173_v3  ;;  %v2577_v17 = vld [vmem:[%s3931_s29] ss:$0 sm:$0xff]  ;;  %s3934_s15 = smov %s3933_s3  ;;  %s3935_s25 = scalar_lea.vmem %s3863_s8, %s3470_s30 }
  0x9c   : > { %2709 = vmatpush3.bf16.msra.mxu1 %v2939_v4  ;;  %v2589_v36 = vld [vmem:[%s3932_s20] ss:$0 sm:$0xff]  ;;  %s3936_s1 = sld [smem:[#allocation26_spill]]  ;;  %s3938_s17 = sld [smem:[#allocation27_spill]] }
  0x9d   : > { %2722 = vmatprep.subr.bf16.mxu1 %v3173_v3  ;;  %p2629_p1 = scmp.ne.s32.totalorder %s3156_s27, 1 }
  0x9e   : > { %2701 = vmatpush3.bf16.msra.mxu0 %v2941_v8 }
  0x9f   : > { %2711 = vmatmul.mubr.msk.bf16.vlgmr.msra.gmra.mrb[0].mxu1 %vm890_vm2, %v866_v9  ;;  %2714 = vmatprep.subr.bf16.mxu0 %v3173_v3 }
  0xa0   : > { %2724 = vmatprep.mubr.msk.bf16.mxu1 %vm3174_vm1, %v3173_v3 }
  0xa1   : > { %2703 = vmatmul.mubr.msk.bf16.vlgmr.msra.gmra.mrb[0].mxu0 %vm890_vm2, %v866_v9 }
  0xa2   : > { %2715 = vmatpush3.bf16.msra.mxu0 %v2942_v10  ;;  %2718 = vmatprep.mubr.msk.bf16.mxu0 %vm3174_vm1, %v3173_v3  ;;  %s3937_s29 = scalar_lea.vmem %s3936_s1, %s3470_s30  ;;  %s3939_s20 = scalar_lea.vmem %s3938_s17, %s3470_s30 }
  0xa3   : > { %2716 = vmatprep.subr.bf16.mxu0 %v3173_v3 }
  0xa6   : > { %2717 = vmatpush3.bf16.msra.mxu0 %v2943_v11 }
  0xa7   : > { %2728 = vmatprep.subr.bf16.mxu0 %v3173_v3 }
  0xa9   : > { %2719 = vmatmul.mubr.msk.bf16.vlgmr.msra.gmra.mrb[4].mxu0 %vm890_vm2, %v866_v9 }
  0xaa   : > { %2730 = vmatprep.mubr.msk.bf16.mxu0 %vm3174_vm1, %v3173_v3 }
 0x172   : > { %v998_v13 = vpop.f32.mrb[0].mxu1 }
 0x173   : > { %v999_v14 = vadd.f32 %v2583_v12, %v998_v13  ;;  %v2712_v15 = vpop.f32.mrb[1].mxu1 }
 0x174   : > { %v1001_v16 = vpop.f32.mrb[2].mxu1  ;;  %v928_v18 = vpop.f32.mrb[0].mxu0 }
 0x175   : > { %v3575_v19 = vpack.c.bf16 %v999_v14, %v999_v14  ;;  %v1002_v20 = vadd.f32 %v2583_v12, %v1001_v16  ;;  %v2713_v21 = vpop.f32.mrb[3].mxu1  ;;  %v2704_v22 = vpop.f32.mrb[1].mxu0  ;;  %v929_v25 = vadd.f32 %v2577_v17, %v928_v18 }
 0x176   : > { %v931_v23 = vpop.f32.mrb[2].mxu0 }
 0x177   : > { %v3577_v24 = vpack.c.bf16 %v1002_v20, %v1002_v20  ;;  %v1086_v26 = vsel %vm1081_vm3, %v3575_v19, 0  ;;  %v2705_v27 = vpop.f32.mrb[3].mxu0  ;;  %v3586_v29 = vpack.c.bf16 %v929_v25, %v929_v25  ;;  %v932_v30 = vadd.f32 %v2577_v17, %v931_v23 }
 0x178   : > { %2723 = vmatpush3.bf16.xpose.msra.mxu1 %v1086_v26 }
 0x179   : > { %1345 = vrot.lane.b32.xlu1 %v3577_v24, %s3175_s7  ;;  %v1132_v28 = vsel %vm1081_vm3, %v3577_v24, 0  ;;  %2734 = vmatprep.subr.bf16.mxu1 %v3173_v3  ;;  %v3589_v34 = vpack.c.bf16 %v932_v30, %v932_v30 }
 0x17a   : > { %2729 = vmatpush3.bf16.xpose.msra.mxu0 %v1132_v28 }
 0x17b   : > { %2740 = vmatprep.subr.bf16.mxu0 %v3173_v3 }
 0x17c   : > { %v1068_v31 = vpop.f32.mrb[4].mxu0 }
 0x17d   : > { %v2720_v32 = vpop.f32.mrb[5].mxu0  ;;  %v1069_v37 = vadd.f32 %v2589_v36, %v1068_v31 }
 0x17e   : > { %v1071_v33 = vpop.f32.mrb[6].mxu0 }
 0x17f   : > { %2725 = vmatmul.mubr.msk.bf16.vlgmr.msra.gmra.mrb[4].mxu1 %vm1081_vm3, %v3586_v29  ;;  %v2721_v35 = vpop.f32.mrb[7].mxu0  ;;  %v1072_v38 = vadd.f32 %v2589_v36, %v1071_v33  ;;  %v3604_v39 = vpack.c.bf16 %v1069_v37, %v1069_v37 }
 0x180   : > { %2736 = vmatprep.mubr.msk.bf16.mxu1 %vm3174_vm1, %v3173_v3 }
 0x181   : > { %2731 = vmatmul.mubr.msk.bf16.vlgmr.msra.gmra.mrb[8].mxu0 %vm1081_vm3, %v3589_v34  ;;  %v3606_v40 = vpack.c.bf16 %v1072_v38, %v1072_v38  ;;  %v1203_v41 = vsel %vm1201_vm4, %v3604_v39, 0 }
 0x182   : > { %2742 = vmatprep.mubr.msk.bf16.mxu0 %vm3174_vm1, %v3173_v3  ;;  %2735 = vmatpush3.bf16.msra.mxu1 %v1203_v41 }
 0x183   : > { %v1249_v42 = vsel %vm1201_vm4, %v3606_v40, 0  ;;  %2746 = vmatprep.subr.bf16.mxu1 %v3173_v3 }
 0x184   : > { %2741 = vmatpush3.bf16.msra.mxu0 %v1249_v42 }
 0x185   : > { %2752 = vmatprep.subr.bf16.mxu0 %v3173_v3 }
 0x1eb   : > { %v1346_v63 = vpop.permute.xlu1 %1345 }
 0x1ec   : > { %v1351_v13 = vsel %vm1081_vm3, %v1346_v63, 0 }
 0x252   : > { %v1122_v43 = vpop.f32.mrb[4].mxu1 }
 0x253   : > { %v2726_v44 = vpop.f32.mrb[5].mxu1  ;;  %v1174_v45 = vsel %vm1081_vm3, %v1122_v43, -inf }
 0x254   : > { %1175 = vmax.xlane.f32.xlu0 %v1174_v45  ;;  %v1125_v46 = vpop.f32.mrb[6].mxu1  ;;  %v1168_v47 = vpop.f32.mrb[8].mxu0 }
 0x255   : > { %v2727_v48 = vpop.f32.mrb[7].mxu1  ;;  %v2732_v49 = vpop.f32.mrb[9].mxu0  ;;  %v1177_v52 = vsel %vm1081_vm3, %v1168_v47, -inf }
 0x256   : > { %v1171_v50 = vpop.f32.mrb[10].mxu0 }
 0x257   : > { %v2733_v51 = vpop.f32.mrb[11].mxu0 }
 0x258   : > { %1178 = vmax.xlane.f32.xlu0 %v1177_v52 }
 0x26e   : > { %1295 = vrot.lane.b32.xlu0 %v3575_v19, %s3175_s7 }
 0x2e1   : > { %v1176_v53 = vpop.xlane.xlu0 %1175 }
 0x2e2   : > { %v1180_v54 = vsub.f32 %v1122_v43, %v1176_v53 }
 0x2e4   : > { %v1182_v55 = vmul.f32 1.442695, %v1180_v54 }
 0x2e5   : > { %v1179_v56 = vpop.xlane.xlu0 %1178 }
 0x2e6   : > { %2952 = vpow2.f32 %v1182_v55  ;;  %v1181_v57 = vsub.f32 %v1168_v47, %v1179_v56 }
 0x2e8   : > { %v1184_v58 = vmul.f32 1.442695, %v1181_v57 }
 0x2e9   : > { %v1296_v5 = vpop.permute.xlu0 %1295 }
 0x2ea   : > { %2954 = vpow2.f32 %v1184_v58  ;;  %v1301_v10 = vsel %vm1081_vm3, %v1296_v5, 0 }
 0x2f0   : > { %v2953_v59 = vpop.eup %2952 }
 0x2f1   : > { %v1186_v60 = vsel %vm1081_vm3, %v2953_v59, 0.0 }
 0x2f2   : > { %1187 = vadd.xlane.f32.xlu1 %v1186_v60 }
 0x2f4   : > { %v2955_v61 = vpop.eup %2954 }
 0x2f5   : > { %v1189_v62 = vsel %vm1081_vm3, %v2955_v61, 0.0 }
 0x2f6   : > { %1190 = vadd.xlane.f32.xlu1 %v1189_v62 }
 0x307   : > { %1293 = vrot.lane.b32.xlu1 %v3586_v29, %s3175_s7 }
 0x30b   : > { %1343 = vrot.lane.b32.xlu1 %v3589_v34, %s3175_s7 }
 0x37f   : > { %v1188_v0 = vpop.xlane.xlu1 %1187 }
 0x380   : > { %2956 = vrcp.f32 %v1188_v0 }
 0x383   : > { %v1191_v1 = vpop.xlane.xlu1 %1190 }
 0x384   : > { %2958 = vrcp.f32 %v1191_v1 }
 0x387   : > { %v1294_v14 = vpop.permute.xlu1 %1293 }
 0x38a   : > { %v2957_v2 = vpop.eup %2956 }
 0x38b   : > { %v1194_v4 = vmul.f32 %v2957_v2, %v2953_v59  ;;  %v1344_v15 = vpop.permute.xlu1 %1343 }
 0x38d   : > { %v1196_v8 = vpack.c.bf16 %v1194_v4, %v1194_v4 }
 0x38e   : > { %v2959_v9 = vpop.eup %2958 }
 0x38f   : > { %v1195_v11 = vmul.f32 %v2959_v9, %v2955_v61  ;;  %2737 = vmatmul.mubr.msk.bf16.vlgmr.msra.gmra.mrb[8].mxu1 %vm1081_vm3, %v1196_v8 }
 0x390   : > { %2747 = vmatpush3.bf16.xpose.msra.mxu1 %v1301_v10  ;;  %2748 = vmatprep.mubr.msk.bf16.mxu1 %vm3174_vm1, %v3173_v3 }
 0x391   : > { %v1197_v12 = vpack.c.bf16 %v1195_v11, %v1195_v11  ;;  %2758 = vmatprep.subr.bf16.mxu1 %v3173_v3 }
 0x393   : > { %2743 = vmatmul.mubr.msk.bf16.vlgmr.msra.gmra.mrb[12].mxu0 %vm1081_vm3, %v1197_v12 }
 0x394   : > { %2753 = vmatpush3.bf16.xpose.msra.mxu0 %v1351_v13  ;;  %2754 = vmatprep.mubr.msk.bf16.mxu0 %vm3174_vm1, %v3173_v3 }
 0x395   : > { %2764 = vmatprep.subr.bf16.mxu0 %v3173_v3 }
 0x397   : > { %2749 = vmatmul.mubr.msk.bf16.vlgmr.msra.gmra.mrb[12].mxu1 %vm1081_vm3, %v1294_v14 }
 0x398   : > { %2760 = vmatprep.mubr.msk.bf16.mxu1 %vm3174_vm1, %v3173_v3 }
 0x39b   : > { %2755 = vmatmul.mubr.msk.bf16.vlgmr.msra.gmra.mrb[16].mxu0 %vm1081_vm3, %v1344_v15 }
 0x39c   : > { %2766 = vmatprep.mubr.msk.bf16.mxu0 %vm3174_vm1, %v3173_v3 }
 0x462   : > { %v1239_v16 = vpop.f32.mrb[8].mxu1 }
 0x463   : > { %v2738_v17 = vpop.f32.mrb[9].mxu1 }
 0x464   : > { %v1242_v18 = vpop.f32.mrb[10].mxu1 }
 0x465   : > { %v2739_v20 = vpop.f32.mrb[11].mxu1 }
 0x466   : > { %v1285_v21 = vpop.f32.mrb[12].mxu0 }
 0x467   : > { %v1291_v22 = vpack.c.bf16 %v1285_v21, %v1239_v16  ;;  %v2744_v23 = vpop.f32.mrb[13].mxu0 }
 0x468   : > { %v1288_v25 = vpop.f32.mrb[14].mxu0 }
 0x469   : > { %1292 = vst.msk [vmem:[#allocation3] sm:$0xff] %vm1081_vm3, %v1291_v22  ;;  %v2745_v26 = vpop.f32.mrb[15].mxu0 }
 0x46a   : > { %v1337_v27 = vpop.f32.mrb[12].mxu1 }
 0x46b   : > { %v2750_v28 = vpop.f32.mrb[13].mxu1  ;;  %v1393_v30 = vsel %vm1081_vm3, %v1337_v27, -inf }
 0x46c   : > { %1394 = vmax.xlane.f32.xlu0 %v1393_v30  ;;  %v1340_v31 = vpop.f32.mrb[14].mxu1 }
 0x46d   : > { %v2751_v32 = vpop.f32.mrb[15].mxu1 }
 0x46e   : > { %v1387_v33 = vpop.f32.mrb[16].mxu0 }
 0x46f   : > { %v2756_v35 = vpop.f32.mrb[17].mxu0  ;;  %v1396_v36 = vsel %vm1081_vm3, %v1387_v33, -inf }
 0x470   : > { %1397 = vmax.xlane.f32.xlu1 %v1396_v36  ;;  %v1390_v37 = vpop.f32.mrb[18].mxu0 }
 0x471   : > { %v2757_v38 = vpop.f32.mrb[19].mxu0 }
 0x481   : > { %1465 = vrot.lane.b32.xlu1 %v3606_v40, %s3175_s7 }
 0x485   : > { %1522 = vrot.lane.b32.xlu1 %v3575_v19, %s3176_s28 }
 0x489   : > { %1572 = vrot.lane.b32.xlu1 %v3577_v24, %s3176_s28 }
 0x48d   : > { %1570 = vrot.lane.b32.xlu1 %v3589_v34, %s3176_s28 }
 0x4f9   : > { %v1395_v41 = vpop.xlane.xlu0 %1394 }
 0x4fa   : > { %v1399_v42 = vsub.f32 %v1337_v27, %v1395_v41 }
 0x4fc   : > { %v1401_v43 = vmul.f32 1.442695, %v1399_v42 }
 0x4fd   : > { %v1398_v44 = vpop.xlane.xlu1 %1397 }
 0x4fe   : > { %2960 = vpow2.f32 %v1401_v43  ;;  %v1400_v45 = vsub.f32 %v1387_v33, %v1398_v44 }
 0x500   : > { %v1403_v46 = vmul.f32 1.442695, %v1400_v45 }
 0x501   : > { %v1466_v47 = vpop.permute.xlu1 %1465 }
 0x502   : > { %2962 = vpow2.f32 %v1403_v46  ;;  %v1471_v48 = vsel %vm1201_vm4, %v1466_v47, 0 }
 0x503   : > { %2765 = vmatpush3.bf16.msra.mxu0 %v1471_v48 }
 0x504   : > { %2776 = vmatprep.subr.bf16.mxu0 %v3173_v3 }
 0x505   : > { %v1523_v58 = vpop.permute.xlu1 %1522 }
 0x506   : > { %v1528_v0 = vsel %vm1081_vm3, %v1523_v58, 0 }
 0x508   : > { %v2961_v49 = vpop.eup %2960 }
 0x509   : > { %v1405_v50 = vsel %vm1081_vm3, %v2961_v49, 0.0  ;;  %v1573_v63 = vpop.permute.xlu1 %1572 }
 0x50a   : > { %1406 = vadd.xlane.f32.xlu0 %v1405_v50  ;;  %v1578_v2 = vsel %vm1081_vm3, %v1573_v63, 0 }
 0x50c   : > { %v2963_v51 = vpop.eup %2962 }
 0x50d   : > { %v1408_v52 = vsel %vm1081_vm3, %v2963_v51, 0.0  ;;  %v1571_v5 = vpop.permute.xlu1 %1570 }
 0x50e   : > { %1409 = vadd.xlane.f32.xlu0 %v1408_v52 }
 0x524   : > { %1417 = vrot.lane.b32.xlu0 %v3604_v39, %s3175_s7 }
 0x528   : > { %1520 = vrot.lane.b32.xlu0 %v3586_v29, %s3176_s28 }
 0x597   : > { %v1407_v53 = vpop.xlane.xlu0 %1406 }
 0x598   : > { %2964 = vrcp.f32 %v1407_v53 }
 0x59b   : > { %v1410_v54 = vpop.xlane.xlu0 %1409 }
 0x59c   : > { %2966 = vrcp.f32 %v1410_v54 }
 0x59f   : > { %v1418_v55 = vpop.permute.xlu0 %1417 }
 0x5a0   : > { %v1423_v56 = vsel %vm1201_vm4, %v1418_v55, 0 }
 0x5a1   : > { %2759 = vmatpush3.bf16.msra.mxu1 %v1423_v56 }
 0x5a2   : > { %v2965_v57 = vpop.eup %2964  ;;  %2770 = vmatprep.subr.bf16.mxu1 %v3173_v3 }
 0x5a3   : > { %v1413_v59 = vmul.f32 %v2965_v57, %v2961_v49  ;;  %v1521_v4 = vpop.permute.xlu0 %1520 }
 0x5a5   : > { %v1415_v60 = vpack.c.bf16 %v1413_v59, %v1413_v59 }
 0x5a6   : > { %v2967_v61 = vpop.eup %2966 }
 0x5a7   : > { %v1414_v62 = vmul.f32 %v2967_v61, %v2963_v51  ;;  %2761 = vmatmul.mubr.msk.bf16.vlgmr.msra.gmra.mrb[16].mxu1 %vm1081_vm3, %v1415_v60 }
 0x5a8   : > { %2772 = vmatprep.mubr.msk.bf16.mxu1 %vm3174_vm1, %v3173_v3 }
 0x5a9   : > { %v1416_v1 = vpack.c.bf16 %v1414_v62, %v1414_v62 }
 0x5aa   : > { %2771 = vmatpush3.bf16.xpose.msra.mxu1 %v1528_v0 }
 0x5ab   : > { %2767 = vmatmul.mubr.msk.bf16.vlgmr.msra.gmra.mrb[20].mxu0 %vm1081_vm3, %v1416_v1  ;;  %2782 = vmatprep.subr.bf16.mxu1 %v3173_v3 }
 0x5ac   : > { %2777 = vmatpush3.bf16.xpose.msra.mxu0 %v1578_v2  ;;  %2778 = vmatprep.mubr.msk.bf16.mxu0 %vm3174_vm1, %v3173_v3 }
 0x5ad   : > { %2788 = vmatprep.subr.bf16.mxu0 %v3173_v3 }
 0x5b1   : > { %2773 = vmatmul.mubr.msk.bf16.vlgmr.msra.gmra.mrb[20].mxu1 %vm1081_vm3, %v1521_v4 }
 0x5b2   : > { %2784 = vmatprep.mubr.msk.bf16.mxu1 %vm3174_vm1, %v3173_v3 }
 0x5b3   : > { %2779 = vmatmul.mubr.msk.bf16.vlgmr.msra.gmra.mrb[24].mxu0 %vm1081_vm3, %v1571_v5 }
 0x5b4   : > { %2790 = vmatprep.mubr.msk.bf16.mxu0 %vm3174_vm1, %v3173_v3 }
 0x67a   : > { %v3677_v8 = vpop.f32.mrb[16].mxu1 }
 0x67b   : > { %v2762_v9 = vpop.f32.mrb[17].mxu1 }
 0x67c   : > { %v1462_v10 = vpop.f32.mrb[18].mxu1 }
 0x67d   : > { %v2763_v11 = vpop.f32.mrb[19].mxu1 }
 0x67e   : > { %v3679_v12 = vpop.f32.mrb[20].mxu0 }
 0x67f   : > { %v1513_v13 = vpack.c.bf16 %v3679_v12, %v3677_v8  ;;  %v2768_v14 = vpop.f32.mrb[21].mxu0 }
 0x680   : > { %v1510_v15 = vpop.f32.mrb[22].mxu0 }
 0x681   : > { %v2769_v16 = vpop.f32.mrb[23].mxu0 }
 0x684   : > { %v1564_v17 = vpop.f32.mrb[20].mxu1 }
 0x685   : > { %v2774_v18 = vpop.f32.mrb[21].mxu1  ;;  %v1620_v20 = vsel %vm1081_vm3, %v1564_v17, -inf }
 0x686   : > { %1621 = vmax.xlane.f32.xlu0 %v1620_v20  ;;  %v1567_v21 = vpop.f32.mrb[22].mxu1  ;;  %v1614_v22 = vpop.f32.mrb[24].mxu0 }
 0x687   : > { %v2775_v23 = vpop.f32.mrb[23].mxu1  ;;  %v2780_v25 = vpop.f32.mrb[25].mxu0  ;;  %v1623_v26 = vsel %vm1081_vm3, %v1614_v22, -inf }
 0x688   : > { %1624 = vmax.xlane.f32.xlu1 %v1623_v26  ;;  %v1617_v27 = vpop.f32.mrb[26].mxu0 }
 0x689   : > { %v2781_v28 = vpop.f32.mrb[27].mxu0 }
 0x699   : > { %1692 = vrot.lane.b32.xlu1 %v3606_v40, %s3176_s28 }
 0x69d   : > { %1749 = vrot.lane.b32.xlu1 %v3575_v19, %s3177_s0 }
 0x6a1   : > { %1799 = vrot.lane.b32.xlu1 %v3577_v24, %s3177_s0 }
 0x6a5   : > { %1797 = vrot.lane.b32.xlu1 %v3589_v34, %s3177_s0 }
 0x713   : > { %v1622_v30 = vpop.xlane.xlu0 %1621 }
 0x714   : > { %v1626_v31 = vsub.f32 %v1564_v17, %v1622_v30 }
 0x715   : > { %v1625_v32 = vpop.xlane.xlu1 %1624 }
 0x716   : > { %v1628_v33 = vmul.f32 1.442695, %v1626_v31  ;;  %v1627_v35 = vsub.f32 %v1614_v22, %v1625_v32 }
 0x718   : > { %2968 = vpow2.f32 %v1628_v33  ;;  %v1630_v36 = vmul.f32 1.442695, %v1627_v35 }
 0x719   : > { %v1693_v37 = vpop.permute.xlu1 %1692 }
 0x71a   : > { %2970 = vpow2.f32 %v1630_v36  ;;  %v1698_v38 = vsel %vm1201_vm4, %v1693_v37, 0 }
 0x71b   : > { %2789 = vmatpush3.bf16.msra.mxu0 %v1698_v38 }
 0x71c   : > { %2800 = vmatprep.subr.bf16.mxu0 %v3173_v3 }
 0x71d   : > { %v1750_v47 = vpop.permute.xlu1 %1749 }
 0x721   : > { %v1800_v52 = vpop.permute.xlu1 %1799 }
 0x722   : > { %v2969_v19 = vpop.eup %2968  ;;  %v1805_v54 = vsel %vm1081_vm3, %v1800_v52, 0 }
 0x723   : > { %v1632_v24 = vsel %vm1081_vm3, %v2969_v19, 0.0 }
 0x724   : > { %v2971_v41 = vpop.eup %2970  ;;  %1633 = vadd.xlane.f32.xlu0 %v1632_v24 }
 0x725   : > { %v1635_v34 = vsel %vm1081_vm3, %v2971_v41, 0.0  ;;  %v1798_v56 = vpop.permute.xlu1 %1797 }
 0x728   : > { %1636 = vadd.xlane.f32.xlu0 %v1635_v34  ;;  %v2945_v34 = vld [vmem:[%s3934_s15 + $0x8] sm:$0xff]  }
 0x73e   : > { %1644 = vrot.lane.b32.xlu0 %v3604_v39, %s3176_s28 }
 0x742   : > { %1747 = vrot.lane.b32.xlu0 %v3586_v29, %s3177_s0  ;;  %v1755_v29 = vsel %vm1081_vm3, %v1750_v47, 0 }
 0x7b1   : > { %v1634_v42 = vpop.xlane.xlu0 %1633 }
 0x7b2   : > { %2972 = vrcp.f32 %v1634_v42 }
 0x7b5   : > { %v1637_v43 = vpop.xlane.xlu0 %1636 }
 0x7b6   : > { %2974 = vrcp.f32 %v1637_v43 }
 0x7b9   : > { %v1645_v44 = vpop.permute.xlu0 %1644 }
 0x7ba   : > { %v1650_v45 = vsel %vm1201_vm4, %v1645_v44, 0 }
 0x7bb   : > { %2783 = vmatpush3.bf16.msra.mxu1 %v1650_v45 }
 0x7bc   : > { %v2973_v46 = vpop.eup %2972  ;;  %2794 = vmatprep.subr.bf16.mxu1 %v3173_v3 }
 0x7bd   : > { %v1640_v48 = vmul.f32 %v2973_v46, %v2969_v19  ;;  %v1748_v55 = vpop.permute.xlu0 %1747 }
 0x7bf   : > { %v1642_v49 = vpack.c.bf16 %v1640_v48, %v1640_v48 }
 0x7c0   : > { %v2975_v50 = vpop.eup %2974 }
 0x7c1   : > { %v1641_v51 = vmul.f32 %v2975_v50, %v2971_v41  ;;  %2785 = vmatmul.mubr.msk.bf16.vlgmr.msra.gmra.mrb[24].mxu1 %vm1081_vm3, %v1642_v49  ;;  %v2944_v41 = vld [vmem:[%s3933_s3] sm:$0xff]  }
 0x7c2   : > { %2796 = vmatprep.mubr.msk.bf16.mxu1 %vm3174_vm1, %v3173_v3 }
 0x7c3   : > { %v1643_v53 = vpack.c.bf16 %v1641_v51, %v1641_v51 }
 0x7c4   : > { %2795 = vmatpush3.bf16.xpose.msra.mxu1 %v1755_v29  ;;  %v2611_v29 = vld [vmem:[%s3935_s25] ss:$0 sm:$0xff] }
 0x7c5   : > { %2791 = vmatmul.mubr.msk.bf16.vlgmr.msra.gmra.mrb[28].mxu0 %vm1081_vm3, %v1643_v53  ;;  %2806 = vmatprep.subr.bf16.mxu1 %v3173_v3 }
 0x7c6   : > { %2801 = vmatpush3.bf16.xpose.msra.mxu0 %v1805_v54  ;;  %2802 = vmatprep.mubr.msk.bf16.mxu0 %vm3174_vm1, %v3173_v3 }
 0x7c7   : > { %2812 = vmatprep.subr.bf16.mxu0 %v3173_v3 }
 0x7cb   : > { %2797 = vmatmul.mubr.msk.bf16.vlgmr.msra.gmra.mrb[28].mxu1 %vm1081_vm3, %v1748_v55 }
 0x7cc   : > { %2808 = vmatprep.mubr.msk.bf16.mxu1 %vm3174_vm1, %v3173_v3 }
 0x7cd   : > { %2803 = vmatmul.mubr.msk.bf16.vlgmr.msra.gmra.mrb[32].mxu0 %vm1081_vm3, %v1798_v56 }
 0x7ce   : > { %2814 = vmatprep.mubr.msk.bf16.mxu0 %vm3174_vm1, %v3173_v3 }
 0x894   : > { %v1686_v57 = vpop.f32.mrb[24].mxu1 }
 0x895   : > { %v2786_v58 = vpop.f32.mrb[25].mxu1 }
 0x896   : > { %v1689_v59 = vpop.f32.mrb[26].mxu1 }
 0x897   : > { %v2787_v60 = vpop.f32.mrb[27].mxu1 }
 0x898   : > { %v1734_v61 = vpop.f32.mrb[28].mxu0 }
 0x899   : > { %v1740_v62 = vpack.c.bf16 %v1734_v61, %v1686_v57  ;;  %v2792_v63 = vpop.f32.mrb[29].mxu0 }
 0x89a   : > { %v1737_v0 = vpop.f32.mrb[30].mxu0 }
 0x89b   : > { %v2793_v1 = vpop.f32.mrb[31].mxu0 }
 0x89e   : > { %v1791_v2 = vpop.f32.mrb[28].mxu1 }
 0x89f   : > { %v2798_v4 = vpop.f32.mrb[29].mxu1  ;;  %v1847_v5 = vsel %vm1081_vm3, %v1791_v2, -inf }
 0x8a0   : > { %1848 = vmax.xlane.f32.xlu0 %v1847_v5  ;;  %v1794_v9 = vpop.f32.mrb[30].mxu1  ;;  %v1841_v10 = vpop.f32.mrb[32].mxu0  ;;  %v2948_v4 = vld [vmem:[%s3518_s24] sm:$0xff]   ;;  %v2949_v5 = vld [vmem:[%s3518_s24 + $0x8] sm:$0xff]  }
 0x8a1   : > { %v2799_v11 = vpop.f32.mrb[31].mxu1  ;;  %v2804_v14 = vpop.f32.mrb[33].mxu0  ;;  %v1850_v15 = vsel %vm1081_vm3, %v1841_v10, -inf }
 0x8a2   : > { %1851 = vmax.xlane.f32.xlu1 %v1850_v15  ;;  %v1844_v16 = vpop.f32.mrb[34].mxu0 }
 0x8a3   : > { %v2805_v17 = vpop.f32.mrb[35].mxu0 }
 0x8b3   : > { %1919 = vrot.lane.b32.xlu1 %v3606_v40, %s3177_s0 }
 0x8b7   : > { %1515 = vrot.lane.b32.xlu1 %v1513_v13, %s3178_s19 }
 0x8bb   : > { %1742 = vrot.lane.b32.xlu1 %v1740_v62, %s3179_s14 }
 0x92d   : > { %v1849_v18 = vpop.xlane.xlu0 %1848 }
 0x92e   : > { %v1853_v20 = vsub.f32 %v1791_v2, %v1849_v18  ;;  %v2946_v2 = vld [vmem:[%s701_s26] sm:$0xff]  }
 0x92f   : > { %v1852_v21 = vpop.xlane.xlu1 %1851 }
 0x930   : > { %v1855_v22 = vmul.f32 1.442695, %v1853_v20  ;;  %v1854_v23 = vsub.f32 %v1841_v10, %v1852_v21 }
 0x932   : > { %2976 = vpow2.f32 %v1855_v22  ;;  %v1857_v25 = vmul.f32 1.442695, %v1854_v23 }
 0x933   : > { %v1920_v26 = vpop.permute.xlu1 %1919 }
 0x934   : > { %2978 = vpow2.f32 %v1857_v25  ;;  %v1925_v27 = vsel %vm1201_vm4, %v1920_v26, 0 }
 0x935   : > { %2813 = vmatpush3.bf16.msra.mxu0 %v1925_v27 }
 0x936   : > { %2826 = vmatprep.subr.bf16.mxu0 %v3173_v3 }
 0x937   : > { %v1516_v40 = vpop.permute.xlu1 %1515 }
 0x938   : > { %1519 = vst.msk [vmem:[#allocation3] sm:$0xff] %vm1518_vm5, %v1516_v40 }
 0x93b   : > { %v1743_v8 = vpop.permute.xlu1 %1742 }
 0x93c   : > { %v2977_v12 = vpop.eup %2976  ;;  %1746 = vst.msk [vmem:[#allocation3] sm:$0xff] %vm1745_vm6, %v1743_v8 }
 0x93d   : > { %v1859_v13 = vsel %vm1081_vm3, %v2977_v12, 0.0 }
 0x93e   : > { %v2979_v28 = vpop.eup %2978  ;;  %1860 = vadd.xlane.f32.xlu0 %v1859_v13 }
 0x93f   : > { %v1862_v30 = vsel %vm1081_vm3, %v2979_v28, 0.0 }
 0x942   : > { %1863 = vadd.xlane.f32.xlu0 %v1862_v30 }
 0x958   : > { %1871 = vrot.lane.b32.xlu0 %v3604_v39, %s3177_s0 }
 0x9cb   : > { %v1861_v31 = vpop.xlane.xlu0 %1860 }
 0x9cc   : > { %2980 = vrcp.f32 %v1861_v31 }
 0x9cf   : > { %v1864_v32 = vpop.xlane.xlu0 %1863 }
 0x9d0   : > { %2982 = vrcp.f32 %v1864_v32 }
 0x9d3   : > { %v1872_v33 = vpop.permute.xlu0 %1871 }
 0x9d4   : > { %v1877_v35 = vsel %vm1201_vm4, %v1872_v33, 0 }
 0x9d5   : > { %2807 = vmatpush3.bf16.msra.mxu1 %v1877_v35  ;;  %v2616_v35 = vld [vmem:[%s3939_s20] ss:$0 sm:$0xff] }
 0x9d6   : > { %v2981_v36 = vpop.eup %2980  ;;  %2818 = vmatprep.subr.bf16.mxu1 %v3173_v3 }
 0x9d7   : > { %v1867_v37 = vmul.f32 %v2981_v36, %v2977_v12 }
 0x9d9   : > { %v1869_v38 = vpack.c.bf16 %v1867_v37, %v1867_v37 }
 0x9da   : > { %v2983_v19 = vpop.eup %2982 }
 0x9db   : > { %v1868_v24 = vmul.f32 %v2983_v19, %v2979_v28  ;;  %2809 = vmatmul.mubr.msk.bf16.vlgmr.msra.gmra.mrb[32].mxu1 %vm1081_vm3, %v1869_v38  ;;  %v2615_v28 = vld [vmem:[%s3937_s29] ss:$0 sm:$0xff] }
 0x9dc   : > { %2822 = vmatprep.mubr.msk.bf16.mxu1 %vm3174_vm1, %v3173_v3  ;;  %2819 = vmatpush3.bf16.msra.mxu1 %v2944_v41  ;;  %v2617_v41 = vld [vmem:[%s838_s22] ss:$0 sm:$0xff] }
 0x9dd   : > { %v1870_v39 = vpack.c.bf16 %v1868_v24, %v1868_v24  ;;  %2820 = vmatprep.subr.bf16.mxu1 %v3173_v3  ;;  %v2950_v24 = vld [vmem:[%s3518_s24 + $0x10] sm:$0xff]  }
 0x9df   : > { %2815 = vmatmul.mubr.msk.bf16.vlgmr.msra.gmra.mrb[36].mxu0 %vm1081_vm3, %v1870_v39  ;;  %v2951_v39 = vld [vmem:[%s3518_s24 + $0x18] sm:$0xff]  }
 0x9e0   : > { %2830 = vmatprep.mubr.msk.bf16.mxu0 %vm3174_vm1, %v3173_v3  ;;  %2821 = vmatpush3.bf16.msra.mxu1 %v2945_v34 }
 0x9e1   : > { %2834 = vmatprep.subr.bf16.mxu1 %v3173_v3  ;;  %2827 = vmatpush3.bf16.msra.mxu0 %v2946_v2 }
 0x9e2   : > { %2828 = vmatprep.subr.bf16.mxu0 %v3173_v3 }
 0xaae   : > { %v1913_v42 = vpop.f32.mrb[32].mxu1 }
 0xaaf   : > { %v2810_v43 = vpop.f32.mrb[33].mxu1 }
 0xab0   : > { %v1916_v44 = vpop.f32.mrb[34].mxu1 }
 0xab1   : > { %v2811_v45 = vpop.f32.mrb[35].mxu1 }
 0xab2   : > { %v1961_v46 = vpop.f32.mrb[36].mxu0 }
 0xab3   : > { %v1967_v47 = vpack.c.bf16 %v1961_v46, %v1913_v42  ;;  %v2816_v48 = vpop.f32.mrb[37].mxu0 }
 0xab4   : > { %v1964_v49 = vpop.f32.mrb[38].mxu0  ;;  %v3181_v48 = vmov 0  }
 0xab5   : > { %1969 = vrot.lane.b32.xlu0 %v1967_v47, %s3180_s5  ;;  %v2817_v50 = vpop.f32.mrb[39].mxu0 }
 0xb27   : > { %v1970_v51 = vpop.permute.xlu0 %1969 }
 0xb28   : > { %1973 = vst.msk [vmem:[#allocation3] sm:$0xff] %vm1972_vm7, %v1970_v51 }
 0xb2f   : > { %v1974_v52 = vld [vmem:[#allocation3] sm:$0xff] }
 0xb30   : > { %2823 = vmatmul.mubr.msk.bf16.vlgmr.msra.gmra.mrb[36].mxu1 %vm890_vm2, %v1974_v52 }
 0xb31   : > { %2842 = vmatprep.mubr.msk.bf16.mxu1 %vm3174_vm1, %v3173_v3  ;;  %2835 = vmatpush3.bf16.msra.mxu1 %v2948_v4 }
 0xb32   : > { %2836 = vmatprep.subr.bf16.mxu1 %v3173_v3 }
 0xb35   : > { %2837 = vmatpush3.bf16.msra.mxu1 %v2949_v5 }
 0xb36   : > { %2838 = vmatprep.subr.bf16.mxu1 %v3173_v3 }
 0xb39   : > { %2839 = vmatpush3.bf16.msra.mxu1 %v2950_v24 }
 0xb3a   : > { %2840 = vmatprep.subr.bf16.mxu1 %v3173_v3  ;;  %v2621_v3 = vld [vmem:[%s846_s18] ss:$0 sm:$0xff] }
 0xb3d   : > { %2841 = vmatpush3.bf16.msra.mxu1 %v2951_v39 }
 0xc03   : > { %v2035_v53 = vpop.f32.mrb[36].mxu1 }
 0xc04   : > { %v2036_v54 = vadd.f32 %v2611_v29, %v2035_v53  ;;  %v2824_v55 = vpop.f32.mrb[37].mxu1 }
 0xc05   : > { %v2038_v56 = vpop.f32.mrb[38].mxu1 }
 0xc06   : > { %v2042_v57 = vadd.f32 %v2036_v54, %v3540_v6  ;;  %v2039_v58 = vadd.f32 %v2611_v29, %v2038_v56  ;;  %v2825_v59 = vpop.f32.mrb[39].mxu1 }
 0xc08   : > { %v2043_v60 = vadd.f32 %v2039_v58, %v3542_v7  ;;  %v2044_v61 = vsel %vm890_vm2, %v2042_v57, 0.0  ;;  %v2053_v63 = vmul.f32 %v2042_v57, %v2042_v57  ;;  %v2947_v7 = vld [vmem:[%s701_s26 + $0x8] sm:$0xff]  }
 0xc09   : > { %2045 = vadd.xlane.f32.xlu1 %v2044_v61  ;;  %2829 = vmatpush3.bf16.msra.mxu0 %v2947_v7 }
 0xc0a   : > { %v2047_v62 = vsel %vm890_vm2, %v2043_v60, 0.0  ;;  %v2055_v0 = vsel %vm890_vm2, %v2053_v63, 0.0  ;;  %v2054_v1 = vmul.f32 %v2043_v60, %v2043_v60 }
 0xc0b   : > { %2048 = vadd.xlane.f32.xlu0 %v2047_v62 }
 0xc0c   : > { %v2058_v6 = vsel %vm890_vm2, %v2054_v1, 0.0 }
 0xc0f   : > { %2056 = vadd.xlane.f32.xlu0 %v2055_v0 }
 0xc13   : > { %2059 = vadd.xlane.f32.xlu0 %v2058_v6 }
 0xc96   : > { %v2046_v9 = vpop.xlane.xlu1 %2045 }
 0xc97   : > { %v2051_v11 = vmul.f32 0.03125, %v2046_v9 }
 0xc98   : > { %v2049_v10 = vpop.xlane.xlu0 %2048 }
 0xc99   : > { %v2063_v15 = vmul.f32 %v2051_v11, %v2051_v11  ;;  %v2052_v16 = vmul.f32 0.03125, %v2049_v10  ;;  %v2070_v8 = vsub.f32 %v2042_v57, %v2051_v11 }
 0xc9b   : > { %v2064_v21 = vmul.f32 %v2052_v16, %v2052_v16  ;;  %v2071_v30 = vsub.f32 %v2043_v60, %v2052_v16 }
 0xc9c   : > { %v2057_v14 = vpop.xlane.xlu0 %2056 }
 0xc9d   : > { %v2061_v17 = vmul.f32 0.03125, %v2057_v14 }
 0xc9f   : > { %v2065_v18 = vsub.f32 %v2061_v17, %v2063_v15 }
 0xca0   : > { %v2060_v20 = vpop.xlane.xlu0 %2059 }
 0xca1   : > { %v2067_v22 = vmax.f32 %v2065_v18, 0.0  ;;  %v2062_v23 = vmul.f32 0.03125, %v2060_v20 }
 0xca3   : > { %v2072_v25 = vadd.f32 1e-12, %v2067_v22  ;;  %v2066_v26 = vsub.f32 %v2062_v23, %v2064_v21  ;;  %v2627_v22 = vld [vmem:[%s849_s9] ss:$0 sm:$0xff] }
 0xca5   : > { %2984 = vrsqrt.f32 %v2072_v25  ;;  %v2068_v27 = vmax.f32 %v2066_v26, 0.0 }
 0xca7   : > { %v2073_v40 = vadd.f32 1e-12, %v2068_v27  ;;  %v2628_v27 = vld [vmem:[%s852_s10] ss:$0 sm:$0xff] }
 0xca9   : > { %2986 = vrsqrt.f32 %v2073_v40 }
 0xcaf   : > { %v2985_v12 = vpop.eup %2984 }
 0xcb0   : > { %v2076_v13 = vmul.f32 %v2985_v12, %v2070_v8 }
 0xcb2   : > { %v2084_v33 = vmul.f32 %v2615_v28, %v2076_v13 }
 0xcb3   : > { %v2987_v31 = vpop.eup %2986 }
 0xcb4   : > { %v2077_v32 = vmul.f32 %v2987_v31, %v2071_v30  ;;  %v2093_v37 = vadd.f32 %v2616_v35, %v2084_v33 }
 0xcb6   : > { %v2085_v36 = vmul.f32 %v2615_v28, %v2077_v32 }
 0xcb8   : > { %v2094_v38 = vadd.f32 %v2616_v35, %v2085_v36 }
 0xcba   : > { %v2095_v19 = vpack.c.bf16 %v2094_v38, %v2093_v37 }
 0xcbc   : > { %2831 = vmatmul.mubr.msk.bf16.vlgmr.msra.gmra.mrb[40].mxu0 %vm890_vm2, %v2095_v19 }
 0xd8f   : > { %v2156_v34 = vpop.f32.mrb[40].mxu0 }
 0xd90   : > { %v2832_v42 = vpop.f32.mrb[41].mxu0  ;;  %v2157_v44 = vadd.f32 %v2617_v41, %v2156_v34 }
 0xd91   : > { %v2159_v43 = vpop.f32.mrb[42].mxu0 }
 0xd92   : > { %v2160_v45 = vadd.f32 %v2617_v41, %v2159_v43  ;;  %v2833_v46 = vpop.f32.mrb[43].mxu0 }
 0xd94   : > { %v2163_v47 = vpack.c.bf16 %v2160_v45, %v2157_v44 }
 0xd96   : > { %v2164_v49 = vmax.bf16 %v3181_v48, %v2163_v47 }
 0xd98   : > { %2843 = vmatmul.mubr.msk.bf16.vlgmr.msra.gmra.mrb[40].mxu1 %vm2204_vm8, %v2164_v49 }
 0xe6b   : > { %v2242_v50 = vpop.f32.mrb[40].mxu1 }
 0xe6c   : > { %v2243_v51 = vadd.f32 %v2621_v3, %v2242_v50  ;;  %v2844_v52 = vpop.f32.mrb[41].mxu1 }
 0xe6d   : > { %v2245_v29 = vpop.f32.mrb[42].mxu1 }
 0xe6e   : > { %v2249_v53 = vadd.f32 %v2243_v51, %v2093_v37  ;;  %v2246_v54 = vadd.f32 %v2621_v3, %v2245_v29  ;;  %v2845_v55 = vpop.f32.mrb[43].mxu1 }
 0xe70   : > { %v2250_v56 = vadd.f32 %v2246_v54, %v2094_v38  ;;  %v2251_v57 = vsel %vm890_vm2, %v2249_v53, 0.0  ;;  %v2259_v58 = vmul.f32 %v2249_v53, %v2249_v53 }
 0xe71   : > { %2252 = vadd.xlane.f32.xlu1 %v2251_v57 }
 0xe72   : > { %v2254_v59 = vsel %vm890_vm2, %v2250_v56, 0.0  ;;  %v2260_v60 = vmul.f32 %v2250_v56, %v2250_v56  ;;  %v2261_v61 = vsel %vm890_vm2, %v2259_v58, 0.0 }
 0xe73   : > { %2255 = vadd.xlane.f32.xlu0 %v2254_v59 }
 0xe74   : > { %v2264_v62 = vsel %vm890_vm2, %v2260_v60, 0.0 }
 0xe75   : > { %2262 = vadd.xlane.f32.xlu1 %v2261_v61 }
 0xe77   : > { %2265 = vadd.xlane.f32.xlu0 %v2264_v62 }
 0xefe   : > { %v2253_v63 = vpop.xlane.xlu1 %2252 }
 0xeff   : > { %v2257_v0 = vmul.f32 0.03125, %v2253_v63 }
 0xf00   : > { %v2256_v1 = vpop.xlane.xlu0 %2255 }
 0xf01   : > { %v2258_v6 = vmul.f32 0.03125, %v2256_v1  ;;  %v2269_v7 = vmul.f32 %v2257_v0, %v2257_v0  ;;  %v2276_v20 = vsub.f32 %v2249_v53, %v2257_v0 }
 0xf02   : > { %v2263_v2 = vpop.xlane.xlu1 %2262 }
 0xf03   : > { %v2267_v4 = vmul.f32 0.03125, %v2263_v2  ;;  %v2270_v9 = vmul.f32 %v2258_v6, %v2258_v6  ;;  %v2277_v23 = vsub.f32 %v2250_v56, %v2258_v6 }
 0xf04   : > { %v2266_v5 = vpop.xlane.xlu0 %2265 }
 0xf05   : > { %v2271_v10 = vsub.f32 %v2267_v4, %v2269_v7  ;;  %v2268_v11 = vmul.f32 0.03125, %v2266_v5 }
 0xf07   : > { %v2273_v14 = vmax.f32 %v2271_v10, 0.0  ;;  %v2272_v15 = vsub.f32 %v2268_v11, %v2270_v9 }
 0xf09   : > { %v2278_v16 = vadd.f32 1e-12, %v2273_v14  ;;  %v2274_v17 = vmax.f32 %v2272_v15, 0.0 }
 0xf0b   : > { %2988 = vrsqrt.f32 %v2278_v16  ;;  %v2279_v18 = vadd.f32 1e-12, %v2274_v17 }
 0xf0d   : > { %2990 = vrsqrt.f32 %v2279_v18 }
 0xf15   : > { %v2989_v21 = vpop.eup %2988 }
 0xf16   : > { %v2282_v25 = vmul.f32 %v2989_v21, %v2276_v20 }
 0xf17   : > { %v2991_v26 = vpop.eup %2990 }
 0xf18   : > { %v2290_v40 = vmul.f32 %v2627_v22, %v2282_v25  ;;  %v2283_v8 = vmul.f32 %v2991_v26, %v2277_v23  ;;  %2306 = sbr.rel (%p2629_p1) target bundleno = 3871 (0xf1f), region = 108 }
 0xf1a   : > { %v2299_v12 = vadd.f32 %v2628_v27, %v2290_v40  ;;  %v2291_v13 = vmul.f32 %v2627_v22, %v2283_v8 }
 0xf1c   : > { %2301 = vst.msk [vmem:[#allocation2] sm:$0xff] %vm890_vm2, %v2299_v12  ;;  %v2300_v28 = vadd.f32 %v2628_v27, %v2291_v13  ;;  %2307 = vst.msk [vmem:[#allocation10] sm:$0xff] (!%p2629_p1), %vm890_vm2, %v2299_v12 }
 0xf1e   : > { %2302 = vst.msk [vmem:[#allocation2 + $0x8] sm:$0xff] %vm890_vm2, %v2300_v28  ;;  %2308 = vst.msk [vmem:[#allocation10 + $0x8] sm:$0xff] (!%p2629_p1), %vm890_vm2, %v2300_v28 }
 0xf1f PF: > { %s3943_s9 = sld [smem:[#allocation20_spill]]  ;;  %s3182_s10 = smov [#allocation10]  }
 0xf20   : > { %s2318_s30 = sshll.u32 %s3182_s10, 4  ;;  %s2319_s30 = int_to_ptr.vmem [resolvable:$true] %s2318_s30 }
 0xf21   : > { %s3080_s25 = scalar_lea.vmem %s2319_s30, 256  ;;  %p3087_p12 = scmp.lt.s32.totalorder %s2319_s30, %s2319_s30 }
 0xf22   : > { %p3081_p4 = scmp.ne.s32.totalorder %s2319_s30, %s3080_s25  ;;  %p3088_p10 = scmp.lt.s32.totalorder %s3080_s25, %s3080_s25 }
 0xf24   : > { %p3089_p0 = por %p3088_p10, %p3087_p12 }
 0xf25   : > { %p2872_p6 = scmp.eq.s32.totalorder %s3943_s9, 1 }
 0xf27   : > { %p3082_p7 = pnand %p3081_p4, %p2872_p6 }
 0xf29   : > { %p3083_p9 = pneg %p3082_p7 }
 0xf2b   : > { %p3090_p8 = pnand %p3089_p0, %p3083_p9 }
 0xf2d   : > { %3093 = shalt.err (!%p3090_p8)
}
 0xf2e   : > { %s3944_s26 = sld [smem:[#allocation32_spill]] }
 0xf34   : > { %s3945_s1 = smov %s3944_s26  ;;  %s3094_s29 = scalar_lea.hbm %s3944_s26, 256 }
 0xf35   : > { %p3095_p13 = scmp.ne.s32.totalorder %s3945_s1, %s3094_s29  ;;  %p3100_p3 = scmp.lt.u32.totalorder %s3094_s29, %s3945_s1 }
 0xf37   : > { %p3096_p2 = pnand %p3095_p13, %p2872_p6 }
 0xf39   : > { %p3097_p5 = pneg %p3096_p2 }
 0xf3b   : > { %p3102_p11 = pnand %p3100_p3, %p3097_p5 }
 0xf3d   : > { %3105 = shalt.err (!%p3102_p11)
}
 0xf3e   : > { %s3183_s28 = smov 128  }
 0xf3f   : > { %2855 = dma.vmem_to_hbm [thread:$0]  (%p2872_p6), %s2319_s30, 256, %s3945_s1, [#allocation6], %s3183_s28, %s3183_s28, %s3178_s19  }
 0xf40   : > { %3139 = dma.done.wait (%p2872_p6), [#allocation6], 256  }
 0xf41   : > { %3141 = vsyncadd (%p2872_p6), [#allocation6], 4294967040 }
 0xf42 PF: > { %s3946_s3 = sld [smem:[#allocation17_spill]]  ;;  %s3947_s24 = sld [smem:[#allocation14_spill]] }
 0xf43   : > { %s3948_s25 = sld [smem:[#allocation15_spill]]  ;;  %s3949_s26 = sld [smem:[#allocation19_spill]] }
 0xf44   : > { %s3950_s27 = sld [smem:[#allocation16_spill]]  ;;  %s3951_s28 = sld [smem:[#allocation18_spill]] }
 0xf48   : > { %s32_s29 = sadd.s32 1, %s3946_s3  }
 0xf49   : > { %p29_p1 = scmp.ge.s32.totalorder %s32_s29, 4  }
 0xf4b   :  { %31 = sbr.rel (!%p29_p1) target bundleno = 19 (0x13), region = 193 }
 0xf52   :  { %2334 = vsyncpa [#allocation5], 1 }
 0xf53   :  { %2336 = vsyncpa [#allocation5 + $0x1], 1 }
 0xf54   :  { %2337 = vsyncpa [#allocation8], 1 }
 0xf55   :  { %2339 = vsyncpa [#allocation8 + $0x1], 1 }
 0xf56   :  { %2340 = vsyncpa [#allocation6], 1 }
 0xf57   :  { %2342 = vsyncpa [#allocation6 + $0x1], 1 }

</bundles_post_ra>
